<compile_context>
chip_gen: v5e
topology: v5e:2x2
jax: 0.10.0
libtpu: 0.0.40
codegen_flags: <defaults>
</compile_context>

<pallas_src>
import functools
import math

import jax
import jax.numpy as jnp
from jax.experimental import pallas as pl
from jax.experimental.pallas import tpu as pltpu

LANE = 128
VMEM_LIMIT = 32 * 1024 * 1024  # safe on v5e/v6e/v7x; everything here is tiny


def _round_up(x, m):
    return (x + m - 1) // m * m


# ----------------------------------------------------------------------------
# Single fused kernel: conv1 -> depthwise -> pointwise -> avgpool -> classifier
# ----------------------------------------------------------------------------
def _fused_forward_kernel(p_ref, w1_ref, b1_ref, w9_ref, bdw_ref,
                          wpw_ref, bpw_ref, wfc_ref, bfc_ref,
                          o_ref, dwpad_ref, *, H, W, BT):
    C = w1_ref.shape[1]        # conv1 / depthwise channels (32)
    F = wpw_ref.shape[1]       # feature width (1024)
    NCP = wfc_ref.shape[1]     # lane-padded num_classes (128)
    HW = H * W
    Kp = p_ref.shape[2]

    # --- conv1: 3x3 s2 p1 as an im2col matmul (BN scale folded into w1) -----
    a1 = p_ref[...].reshape(BT * HW, Kp)                              # bf16
    h1 = jnp.dot(a1, w1_ref[...], preferred_element_type=jnp.float32)
    h1 = jnp.maximum(h1 + b1_ref[...], 0.0)                           # (BT*HW, C)

    # --- depthwise 3x3 s1 p1: zero-halo scratch + 9 shifted taps ------------
    # Zero every step (borders must be zero on every core under megacore).
    dwpad_ref[...] = jnp.zeros_like(dwpad_ref)
    dwpad_ref[:, 1:H + 1, 1:W + 1, :] = h1.reshape(BT, H, W, C)
    xv = dwpad_ref[...]                                               # (BT,H+2,W+2,C) f32
    w9 = w9_ref[...]                                                  # (9, C), dw scale folded
    acc = jnp.zeros((BT, H, W, C), jnp.float32)
    for ky in range(3):
        for kx in range(3):
            acc = acc + xv[:, ky:ky + H, kx:kx + W, :] * w9[ky * 3 + kx, :]
    dw = jnp.maximum(acc + bdw_ref[0, :], 0.0)                        # (BT,H,W,C)

    # --- pointwise 1x1 conv (+BN shift+ReLU) on the MXU ----------------------
    a2 = dw.reshape(BT * HW, C).astype(jnp.bfloat16)
    y = jnp.dot(a2, wpw_ref[...], preferred_element_type=jnp.float32)  # (BT*HW, F)
    y = jnp.maximum(y + bpw_ref[...], 0.0)

    # --- global average pool BEFORE the classifier ---------------------------
    pooled = jnp.sum(y.reshape(BT, HW, F), axis=1) * (1.0 / HW)        # (BT, F)

    # --- classifier: one small FC matmul, lane-dense (padded) output ---------
    logits = jnp.dot(pooled.astype(jnp.bfloat16), wfc_ref[...],
                     preferred_element_type=jnp.float32) + bfc_ref[...]
    o_ref[...] = logits.reshape(BT, 1, NCP)


def fused_vgg_forward(patches, w1, b1, w9, bdw, wpw, bpw, wfc, bfc,
                      *, H, W, bt):
    """patches: (N, H*W, Kp) bf16 im2col rows of conv1. Returns (N, NCP) f32."""
    N, HW, Kp = patches.shape
    assert HW == H * W
    C = w1.shape[1]
    F = wpw.shape[1]
    NCP = wfc.shape[1]

    Np = _round_up(N, bt)
    if Np != N:
        patches = jnp.pad(patches, ((0, Np - N), (0, 0), (0, 0)))

    out = pl.pallas_call(
        functools.partial(_fused_forward_kernel, H=H, W=W, BT=bt),
        out_shape=jax.ShapeDtypeStruct((Np, 1, NCP), jnp.float32),
        grid=(Np // bt,),
        in_specs=[
            pl.BlockSpec((bt, HW, Kp), lambda b: (b, 0, 0)),
            pl.BlockSpec((Kp, C), lambda b: (0, 0)),
            pl.BlockSpec((1, C), lambda b: (0, 0)),
            pl.BlockSpec((9, C), lambda b: (0, 0)),
            pl.BlockSpec((1, C), lambda b: (0, 0)),
            pl.BlockSpec((C, F), lambda b: (0, 0)),
            pl.BlockSpec((1, F), lambda b: (0, 0)),
            pl.BlockSpec((F, NCP), lambda b: (0, 0)),
            pl.BlockSpec((1, NCP), lambda b: (0, 0)),
        ],
        out_specs=pl.BlockSpec((bt, 1, NCP), lambda b: (b, 0, 0)),
        scratch_shapes=[pltpu.VMEM((bt, H + 2, W + 2, C), jnp.float32)],
        compiler_params=pltpu.CompilerParams(
            dimension_semantics=("parallel",),      # shard batch tiles across TCs
            vmem_limit_bytes=VMEM_LIMIT),
    )(patches, w1, b1, w9, bdw, wpw, bpw, wfc, bfc)
    return out[:N, 0, :]


# ----------------------------------------------------------------------------
# Host-side glue (im2col, BN folding, init) — plain JAX, fused under jit
# ----------------------------------------------------------------------------
def im2col_nhwc(x, kh, kw, stride, pad):
    """x: (N, H, W, C) NHWC -> (N, Ho*Wo, kh*kw*C); column order (ky, kx, c)."""
    N, H, W, C = x.shape
    xp = jnp.pad(x, ((0, 0), (pad, pad), (pad, pad), (0, 0)))
    Ho = (H + 2 * pad - kh) // stride + 1
    Wo = (W + 2 * pad - kw) // stride + 1
    taps = []
    for ky in range(kh):
        for kx in range(kw):
            taps.append(xp[:, ky:ky + Ho * stride:stride,
                           kx:kx + Wo * stride:stride, :])
    p = jnp.stack(taps, axis=3)                          # (N, Ho, Wo, kh*kw, C)
    return p.reshape(N, Ho * Wo, kh * kw * C), (Ho, Wo)


def bn_fold(gamma, beta, running_mean, running_var, eps=1e-5):
    scale = gamma / jnp.sqrt(running_var + eps)
    shift = beta - running_mean * scale
    return scale, shift


def init_params(key, cin=3, c1=32, cfeat=1024, num_classes=10):
    k1, k2, k3, k4 = jax.random.split(key, 4)
    params = {}
    std1 = math.sqrt(2.0 / (c1 * 9))                          # kaiming fan_out
    params["w1"] = jax.random.normal(k1, (c1, cin, 3, 3), jnp.float32) * std1
    std_dw = math.sqrt(2.0 / (c1 * 9))
    params["w_dw"] = jax.random.normal(k2, (c1, 1, 3, 3), jnp.float32) * std_dw
    std_pw = math.sqrt(2.0 / (cfeat * 1))
    params["w_pw"] = jax.random.normal(k3, (cfeat, c1, 1, 1), jnp.float32) * std_pw
    for name, c in (("bn1", c1), ("bn_dw", c1), ("bn_pw", cfeat)):
        s, sh = bn_fold(jnp.ones((c,)), jnp.zeros((c,)),
                        jnp.zeros((c,)), jnp.ones((c,)))
        params[name + "_scale"], params[name + "_shift"] = s, sh
    params["w_fc"] = jax.random.normal(k4, (num_classes, cfeat), jnp.float32) * 0.01
    params["b_fc"] = jnp.zeros((num_classes,), jnp.float32)
    return params


@jax.jit
def vgg_forward(x_nchw, params):
    """Forward pass; x_nchw: (N, C, H, W) float32, like the PyTorch module."""
    x = jnp.transpose(x_nchw, (0, 2, 3, 1)).astype(jnp.float32)       # NHWC
    N = x.shape[0]

    # conv1 im2col rows (3x3 s2 p1); K padded 27 -> 32 in a single pad pass.
    patches, (Ho, Wo) = im2col_nhwc(x, 3, 3, stride=2, pad=1)          # (N, HW, 27)
    c1 = params["w1"].shape[0]
    cin = params["w1"].shape[1]
    k_raw = 9 * cin
    k_pad = _round_up(k_raw, 8)
    patches = jnp.pad(patches, ((0, 0), (0, 0), (0, k_pad - k_raw)))
    patches = patches.astype(jnp.bfloat16)

    # conv1 weight (K, c1) with BN1 scale folded into the columns.
    w1_mat = jnp.transpose(params["w1"], (2, 3, 1, 0)).reshape(k_raw, c1)
    w1_mat = w1_mat * params["bn1_scale"][None, :]
    w1_mat = jnp.pad(w1_mat, ((0, k_pad - k_raw), (0, 0))).astype(jnp.bfloat16)
    b1 = params["bn1_shift"].reshape(1, c1).astype(jnp.float32)

    # depthwise weights (9, c1), dw BN scale folded; shift stays additive.
    w9 = jnp.transpose(params["w_dw"][:, 0], (1, 2, 0)).reshape(9, c1)
    w9 = (w9 * params["bn_dw_scale"][None, :]).astype(jnp.float32)
    bdw = params["bn_dw_shift"].reshape(1, c1).astype(jnp.float32)

    # pointwise weights (c1, cfeat), pw BN scale folded into columns.
    cfeat = params["w_pw"].shape[0]
    wpw = params["w_pw"][:, :, 0, 0].T * params["bn_pw_scale"][None, :]
    wpw = wpw.astype(jnp.bfloat16)
    bpw = params["bn_pw_shift"].reshape(1, cfeat).astype(jnp.float32)

    # classifier, lane-padded num_classes -> 128 (sliced off below).
    num_classes = params["w_fc"].shape[0]
    ncp = _round_up(num_classes, LANE)
    wfc = jnp.pad(params["w_fc"].T,
                  ((0, 0), (0, ncp - num_classes))).astype(jnp.bfloat16)
    bfc = jnp.pad(params["b_fc"], (0, ncp - num_classes)).reshape(1, ncp)
    bfc = bfc.astype(jnp.float32)

    # Batch tile: keep >=2 grid steps when N>=2 (v7x megacore) while batching
    # several samples per step when N is larger (feeds v6e's wide MXU).
    bt = 1 if N <= 2 else min(8, max(1, N // 2))

    logits_pad = fused_vgg_forward(patches, w1_mat, b1, w9, bdw,
                                   wpw, bpw, wfc, bfc, H=Ho, W=Wo, bt=bt)
    return logits_pad[:, :num_classes]


# TODO(synk): add_dataset / set_dataset multi-head bookkeeping is host-side
# module state (choosing the active Linear head); a single active head is
# modeled here.

if __name__ == "__main__":
    key = jax.random.PRNGKey(0)
    kx, kp = jax.random.split(key)
    # Small shapes consistent with the module: batch=2, 3-channel 16x16 images.
    x = jax.random.normal(kx, (2, 3, 16, 16), jnp.float32)
    params = init_params(kp, cin=3, c1=32, cfeat=1024, num_classes=10)

    logits = vgg_forward(x, params)
    logits = jax.block_until_ready(logits)
    assert logits.shape == (2, 10) and logits.dtype == jnp.float32
    assert bool(jnp.all(jnp.isfinite(logits)))
    print("KERNEL_OK")
</pallas_src>

<mosaic_0001>
module attributes {stable_mosaic.version = 11 : i64} {
  func.func @_fused_forward_kernel(%arg0: i32, %arg1: memref<1x64x32xbf16, #tpu.memory_space<vmem>>, %arg2: memref<32x32xbf16, #tpu.memory_space<vmem>>, %arg3: memref<1x32xf32, #tpu.memory_space<vmem>>, %arg4: memref<9x32xf32, #tpu.memory_space<vmem>>, %arg5: memref<1x32xf32, #tpu.memory_space<vmem>>, %arg6: memref<32x1024xbf16, #tpu.memory_space<vmem>>, %arg7: memref<1x1024xf32, #tpu.memory_space<vmem>>, %arg8: memref<1024x128xbf16, #tpu.memory_space<vmem>>, %arg9: memref<1x128xf32, #tpu.memory_space<vmem>>, %arg10: memref<1x1x128xf32, #tpu.memory_space<vmem>>, %arg11: memref<1x10x10x32xf32, #tpu.memory_space<vmem>>) attributes {dimension_semantics = [#tpu.dimension_semantics<parallel>], iteration_bounds = array<i64: 2>, scalar_prefetch = 0 : i64, scratch_operands = 1 : i64, tpu.core_type = #tpu.core_type<tc>, window_params = [{transform_indices = @transform_0, window_bounds = array<i64: 1, 64, 32>}, {pipeline_mode = #tpu.pipeline_mode<synchronous>, transform_indices = @transform_1, window_bounds = array<i64: 32, 32>}, {pipeline_mode = #tpu.pipeline_mode<synchronous>, transform_indices = @transform_2, window_bounds = array<i64: 1, 32>}, {pipeline_mode = #tpu.pipeline_mode<synchronous>, transform_indices = @transform_3, window_bounds = array<i64: 9, 32>}, {pipeline_mode = #tpu.pipeline_mode<synchronous>, transform_indices = @transform_4, window_bounds = array<i64: 1, 32>}, {pipeline_mode = #tpu.pipeline_mode<synchronous>, transform_indices = @transform_5, window_bounds = array<i64: 32, 1024>}, {pipeline_mode = #tpu.pipeline_mode<synchronous>, transform_indices = @transform_6, window_bounds = array<i64: 1, 1024>}, {pipeline_mode = #tpu.pipeline_mode<synchronous>, transform_indices = @transform_7, window_bounds = array<i64: 1024, 128>}, {pipeline_mode = #tpu.pipeline_mode<synchronous>, transform_indices = @transform_8, window_bounds = array<i64: 1, 128>}, {transform_indices = @transform_9, window_bounds = array<i64: 1, 1, 128>}]} {
    %c0 = arith.constant 0 : index
    %c0_0 = arith.constant 0 : index
    %c0_1 = arith.constant 0 : index
    %0 = vector.load %arg1[%c0, %c0_0, %c0_1] : memref<1x64x32xbf16, #tpu.memory_space<vmem>>, vector<1x64x32xbf16>
    %1 = vector.shape_cast %0 : vector<1x64x32xbf16> to vector<64x32xbf16>
    %c0_2 = arith.constant 0 : index
    %c0_3 = arith.constant 0 : index
    %2 = vector.load %arg2[%c0_2, %c0_3] : memref<32x32xbf16, #tpu.memory_space<vmem>>, vector<32x32xbf16>
    %cst = arith.constant dense<0.000000e+00> : vector<64x32xf32>
    %3 = tpu.matmul %1, %2, %cst {dimension_numbers = #tpu.dot_dimension_numbers<[1], [0], [0], [1], [0, 0, 1, 1], [], []>} : vector<64x32xbf16>, vector<32x32xbf16>, vector<64x32xf32> -> vector<64x32xf32>
    %c0_4 = arith.constant 0 : index
    %c0_5 = arith.constant 0 : index
    %4 = vector.load %arg3[%c0_4, %c0_5] : memref<1x32xf32, #tpu.memory_space<vmem>>, vector<1x32xf32>
    %5 = vector.broadcast %4 : vector<1x32xf32> to vector<64x32xf32>
    %6 = arith.addf %3, %5 : vector<64x32xf32>
    %cst_6 = arith.constant 0.000000e+00 : f32
    %7 = vector.broadcast %cst_6 : f32 to vector<64x32xf32>
    %8 = arith.maximumf %6, %7 : vector<64x32xf32>
    %cst_7 = arith.constant 0.000000e+00 : f32
    %9 = vector.broadcast %cst_7 : f32 to vector<1x10x10x32xf32>
    %c0_8 = arith.constant 0 : index
    %c0_9 = arith.constant 0 : index
    %c0_10 = arith.constant 0 : index
    %c0_11 = arith.constant 0 : index
    %10 = vector.load %arg11[%c0_8, %c0_9, %c0_10, %c0_11] : memref<1x10x10x32xf32, #tpu.memory_space<vmem>>, vector<1x10x10x32xf32>
    tpu.vector_store %arg11[%c0_8, %c0_9, %c0_10, %c0_11], %9 {strides = array<i32>} : memref<1x10x10x32xf32, #tpu.memory_space<vmem>>, vector<1x10x10x32xf32>,
    %11 = vector.shape_cast %8 : vector<64x32xf32> to vector<1x8x8x32xf32>
    %c0_12 = arith.constant 0 : index
    %c1 = arith.constant 1 : index
    %c1_13 = arith.constant 1 : index
    %c0_14 = arith.constant 0 : index
    %12 = vector.load %arg11[%c0_12, %c1, %c1_13, %c0_14] : memref<1x10x10x32xf32, #tpu.memory_space<vmem>>, vector<1x8x8x32xf32>
    tpu.vector_store %arg11[%c0_12, %c1, %c1_13, %c0_14], %11 {strides = array<i32>} : memref<1x10x10x32xf32, #tpu.memory_space<vmem>>, vector<1x8x8x32xf32>,
    %c0_15 = arith.constant 0 : index
    %c0_16 = arith.constant 0 : index
    %c0_17 = arith.constant 0 : index
    %c0_18 = arith.constant 0 : index
    %13 = vector.load %arg11[%c0_15, %c0_16, %c0_17, %c0_18] : memref<1x10x10x32xf32, #tpu.memory_space<vmem>>, vector<1x10x10x32xf32>
    %c0_19 = arith.constant 0 : index
    %c0_20 = arith.constant 0 : index
    %14 = vector.load %arg4[%c0_19, %c0_20] : memref<9x32xf32, #tpu.memory_space<vmem>>, vector<9x32xf32>
    %cst_21 = arith.constant 0.000000e+00 : f32
    %15 = vector.broadcast %cst_21 : f32 to vector<1x8x8x32xf32>
    %16 = vector.extract_strided_slice %13 {offsets = [0, 0, 0, 0], sizes = [1, 8, 8, 32], strides = [1, 1, 1, 1]} : vector<1x10x10x32xf32> to vector<1x8x8x32xf32>
    %17 = vector.extract_strided_slice %14 {offsets = [0, 0], sizes = [1, 32], strides = [1, 1]} : vector<9x32xf32> to vector<1x32xf32>
    %18 = vector.shape_cast %17 : vector<1x32xf32> to vector<32xf32>
    %19 = vector.shape_cast %18 : vector<32xf32> to vector<1x1x1x32xf32>
    %20 = vector.broadcast %19 : vector<1x1x1x32xf32> to vector<1x8x8x32xf32>
    %21 = arith.mulf %16, %20 : vector<1x8x8x32xf32>
    %22 = arith.addf %15, %21 : vector<1x8x8x32xf32>
    %23 = vector.extract_strided_slice %13 {offsets = [0, 0, 1, 0], sizes = [1, 8, 8, 32], strides = [1, 1, 1, 1]} : vector<1x10x10x32xf32> to vector<1x8x8x32xf32>
    %24 = vector.extract_strided_slice %14 {offsets = [1, 0], sizes = [1, 32], strides = [1, 1]} : vector<9x32xf32> to vector<1x32xf32>
    %25 = vector.shape_cast %24 : vector<1x32xf32> to vector<32xf32>
    %26 = vector.shape_cast %25 : vector<32xf32> to vector<1x1x1x32xf32>
    %27 = vector.broadcast %26 : vector<1x1x1x32xf32> to vector<1x8x8x32xf32>
    %28 = arith.mulf %23, %27 : vector<1x8x8x32xf32>
    %29 = arith.addf %22, %28 : vector<1x8x8x32xf32>
    %30 = vector.extract_strided_slice %13 {offsets = [0, 0, 2, 0], sizes = [1, 8, 8, 32], strides = [1, 1, 1, 1]} : vector<1x10x10x32xf32> to vector<1x8x8x32xf32>
    %31 = vector.extract_strided_slice %14 {offsets = [2, 0], sizes = [1, 32], strides = [1, 1]} : vector<9x32xf32> to vector<1x32xf32>
    %32 = vector.shape_cast %31 : vector<1x32xf32> to vector<32xf32>
    %33 = vector.shape_cast %32 : vector<32xf32> to vector<1x1x1x32xf32>
    %34 = vector.broadcast %33 : vector<1x1x1x32xf32> to vector<1x8x8x32xf32>
    %35 = arith.mulf %30, %34 : vector<1x8x8x32xf32>
    %36 = arith.addf %29, %35 : vector<1x8x8x32xf32>
    %37 = vector.extract_strided_slice %13 {offsets = [0, 1, 0, 0], sizes = [1, 8, 8, 32], strides = [1, 1, 1, 1]} : vector<1x10x10x32xf32> to vector<1x8x8x32xf32>
    %38 = vector.extract_strided_slice %14 {offsets = [3, 0], sizes = [1, 32], strides = [1, 1]} : vector<9x32xf32> to vector<1x32xf32>
    %39 = vector.shape_cast %38 : vector<1x32xf32> to vector<32xf32>
    %40 = vector.shape_cast %39 : vector<32xf32> to vector<1x1x1x32xf32>
    %41 = vector.broadcast %40 : vector<1x1x1x32xf32> to vector<1x8x8x32xf32>
    %42 = arith.mulf %37, %41 : vector<1x8x8x32xf32>
    %43 = arith.addf %36, %42 : vector<1x8x8x32xf32>
    %44 = vector.extract_strided_slice %13 {offsets = [0, 1, 1, 0], sizes = [1, 8, 8, 32], strides = [1, 1, 1, 1]} : vector<1x10x10x32xf32> to vector<1x8x8x32xf32>
    %45 = vector.extract_strided_slice %14 {offsets = [4, 0], sizes = [1, 32], strides = [1, 1]} : vector<9x32xf32> to vector<1x32xf32>
    %46 = vector.shape_cast %45 : vector<1x32xf32> to vector<32xf32>
    %47 = vector.shape_cast %46 : vector<32xf32> to vector<1x1x1x32xf32>
    %48 = vector.broadcast %47 : vector<1x1x1x32xf32> to vector<1x8x8x32xf32>
    %49 = arith.mulf %44, %48 : vector<1x8x8x32xf32>
    %50 = arith.addf %43, %49 : vector<1x8x8x32xf32>
    %51 = vector.extract_strided_slice %13 {offsets = [0, 1, 2, 0], sizes = [1, 8, 8, 32], strides = [1, 1, 1, 1]} : vector<1x10x10x32xf32> to vector<1x8x8x32xf32>
    %52 = vector.extract_strided_slice %14 {offsets = [5, 0], sizes = [1, 32], strides = [1, 1]} : vector<9x32xf32> to vector<1x32xf32>
    %53 = vector.shape_cast %52 : vector<1x32xf32> to vector<32xf32>
    %54 = vector.shape_cast %53 : vector<32xf32> to vector<1x1x1x32xf32>
    %55 = vector.broadcast %54 : vector<1x1x1x32xf32> to vector<1x8x8x32xf32>
    %56 = arith.mulf %51, %55 : vector<1x8x8x32xf32>
    %57 = arith.addf %50, %56 : vector<1x8x8x32xf32>
    %58 = vector.extract_strided_slice %13 {offsets = [0, 2, 0, 0], sizes = [1, 8, 8, 32], strides = [1, 1, 1, 1]} : vector<1x10x10x32xf32> to vector<1x8x8x32xf32>
    %59 = vector.extract_strided_slice %14 {offsets = [6, 0], sizes = [1, 32], strides = [1, 1]} : vector<9x32xf32> to vector<1x32xf32>
    %60 = vector.shape_cast %59 : vector<1x32xf32> to vector<32xf32>
    %61 = vector.shape_cast %60 : vector<32xf32> to vector<1x1x1x32xf32>
    %62 = vector.broadcast %61 : vector<1x1x1x32xf32> to vector<1x8x8x32xf32>
    %63 = arith.mulf %58, %62 : vector<1x8x8x32xf32>
    %64 = arith.addf %57, %63 : vector<1x8x8x32xf32>
    %65 = vector.extract_strided_slice %13 {offsets = [0, 2, 1, 0], sizes = [1, 8, 8, 32], strides = [1, 1, 1, 1]} : vector<1x10x10x32xf32> to vector<1x8x8x32xf32>
    %66 = vector.extract_strided_slice %14 {offsets = [7, 0], sizes = [1, 32], strides = [1, 1]} : vector<9x32xf32> to vector<1x32xf32>
    %67 = vector.shape_cast %66 : vector<1x32xf32> to vector<32xf32>
    %68 = vector.shape_cast %67 : vector<32xf32> to vector<1x1x1x32xf32>
    %69 = vector.broadcast %68 : vector<1x1x1x32xf32> to vector<1x8x8x32xf32>
    %70 = arith.mulf %65, %69 : vector<1x8x8x32xf32>
    %71 = arith.addf %64, %70 : vector<1x8x8x32xf32>
    %72 = vector.extract_strided_slice %13 {offsets = [0, 2, 2, 0], sizes = [1, 8, 8, 32], strides = [1, 1, 1, 1]} : vector<1x10x10x32xf32> to vector<1x8x8x32xf32>
    %73 = vector.extract_strided_slice %14 {offsets = [8, 0], sizes = [1, 32], strides = [1, 1]} : vector<9x32xf32> to vector<1x32xf32>
    %74 = vector.shape_cast %73 : vector<1x32xf32> to vector<32xf32>
    %75 = vector.shape_cast %74 : vector<32xf32> to vector<1x1x1x32xf32>
    %76 = vector.broadcast %75 : vector<1x1x1x32xf32> to vector<1x8x8x32xf32>
    %77 = arith.mulf %72, %76 : vector<1x8x8x32xf32>
    %78 = arith.addf %71, %77 : vector<1x8x8x32xf32>
    %c0_22 = arith.constant 0 : index
    %c0_23 = arith.constant 0 : index
    %79 = vector.load %arg5[%c0_22, %c0_23] : memref<1x32xf32, #tpu.memory_space<vmem>>, vector<1x32xf32>
    %80 = vector.shape_cast %79 : vector<1x32xf32> to vector<32xf32>
    %81 = vector.shape_cast %80 : vector<32xf32> to vector<1x1x1x32xf32>
    %82 = vector.broadcast %81 : vector<1x1x1x32xf32> to vector<1x8x8x32xf32>
    %83 = arith.addf %78, %82 : vector<1x8x8x32xf32>
    %cst_24 = arith.constant 0.000000e+00 : f32
    %84 = vector.broadcast %cst_24 : f32 to vector<1x8x8x32xf32>
    %85 = arith.maximumf %83, %84 : vector<1x8x8x32xf32>
    %86 = vector.shape_cast %85 : vector<1x8x8x32xf32> to vector<64x32xf32>
    %87 = arith.truncf %86 : vector<64x32xf32> to vector<64x32xbf16>
    %c0_25 = arith.constant 0 : index
    %c0_26 = arith.constant 0 : index
    %88 = vector.load %arg6[%c0_25, %c0_26] : memref<32x1024xbf16, #tpu.memory_space<vmem>>, vector<32x1024xbf16>
    %cst_27 = arith.constant dense<0.000000e+00> : vector<64x1024xf32>
    %89 = tpu.matmul %87, %88, %cst_27 {dimension_numbers = #tpu.dot_dimension_numbers<[1], [0], [0], [1], [0, 0, 1, 1], [], []>} : vector<64x32xbf16>, vector<32x1024xbf16>, vector<64x1024xf32> -> vector<64x1024xf32>
    %c0_28 = arith.constant 0 : index
    %c0_29 = arith.constant 0 : index
    %90 = vector.load %arg7[%c0_28, %c0_29] : memref<1x1024xf32, #tpu.memory_space<vmem>>, vector<1x1024xf32>
    %91 = vector.broadcast %90 : vector<1x1024xf32> to vector<64x1024xf32>
    %92 = arith.addf %89, %91 : vector<64x1024xf32>
    %cst_30 = arith.constant 0.000000e+00 : f32
    %93 = vector.broadcast %cst_30 : f32 to vector<64x1024xf32>
    %94 = arith.maximumf %92, %93 : vector<64x1024xf32>
    %95 = vector.shape_cast %94 : vector<64x1024xf32> to vector<1x64x1024xf32>
    %cst_31 = arith.constant dense<0.000000e+00> : vector<1x1024xf32>
    %96 = vector.multi_reduction <add>, %95, %cst_31 [1] : vector<1x64x1024xf32> to vector<1x1024xf32>
    %cst_32 = arith.constant 1.562500e-02 : f32
    %97 = vector.broadcast %cst_32 : f32 to vector<1x1024xf32>
    %98 = arith.mulf %96, %97 : vector<1x1024xf32>
    %99 = arith.truncf %98 : vector<1x1024xf32> to vector<1x1024xbf16>
    %c0_33 = arith.constant 0 : index
    %c0_34 = arith.constant 0 : index
    %100 = vector.load %arg8[%c0_33, %c0_34] : memref<1024x128xbf16, #tpu.memory_space<vmem>>, vector<1024x128xbf16>
    %cst_35 = arith.constant dense<0.000000e+00> : vector<1x128xf32>
    %101 = tpu.matmul %99, %100, %cst_35 {dimension_numbers = #tpu.dot_dimension_numbers<[1], [0], [0], [1], [0, 0, 1, 1], [], []>} : vector<1x1024xbf16>, vector<1024x128xbf16>, vector<1x128xf32> -> vector<1x128xf32>
    %c0_36 = arith.constant 0 : index
    %c0_37 = arith.constant 0 : index
    %102 = vector.load %arg9[%c0_36, %c0_37] : memref<1x128xf32, #tpu.memory_space<vmem>>, vector<1x128xf32>
    %103 = arith.addf %101, %102 : vector<1x128xf32>
    %104 = vector.shape_cast %103 : vector<1x128xf32> to vector<1x1x128xf32>
    %c0_38 = arith.constant 0 : index
    %c0_39 = arith.constant 0 : index
    %c0_40 = arith.constant 0 : index
    %105 = vector.load %arg10[%c0_38, %c0_39, %c0_40] : memref<1x1x128xf32, #tpu.memory_space<vmem>>, vector<1x1x128xf32>
    tpu.vector_store %arg10[%c0_38, %c0_39, %c0_40], %104 {strides = array<i32>} : memref<1x1x128xf32, #tpu.memory_space<vmem>>, vector<1x1x128xf32>,
    return
  }
  func.func @transform_0(%arg0: i32) -> (i32, i32, i32) {
    %c0_i32 = arith.constant 0 : i32
    %c0_i32_0 = arith.constant 0 : i32
    %c0_i32_1 = arith.constant 0 : i32
    return %arg0, %c0_i32, %c0_i32_0 : i32, i32, i32
  }
  func.func @transform_1(%arg0: i32) -> (i32, i32) {
    %c0_i32 = arith.constant 0 : i32
    %c0_i32_0 = arith.constant 0 : i32
    %c0_i32_1 = arith.constant 0 : i32
    return %c0_i32, %c0_i32_0 : i32, i32
  }
  func.func @transform_2(%arg0: i32) -> (i32, i32) {
    %c0_i32 = arith.constant 0 : i32
    %c0_i32_0 = arith.constant 0 : i32
    %c0_i32_1 = arith.constant 0 : i32
    return %c0_i32, %c0_i32_0 : i32, i32
  }
  func.func @transform_3(%arg0: i32) -> (i32, i32) {
    %c0_i32 = arith.constant 0 : i32
    %c0_i32_0 = arith.constant 0 : i32
    %c0_i32_1 = arith.constant 0 : i32
    return %c0_i32, %c0_i32_0 : i32, i32
  }
  func.func @transform_4(%arg0: i32) -> (i32, i32) {
    %c0_i32 = arith.constant 0 : i32
    %c0_i32_0 = arith.constant 0 : i32
    %c0_i32_1 = arith.constant 0 : i32
    return %c0_i32, %c0_i32_0 : i32, i32
  }
  func.func @transform_5(%arg0: i32) -> (i32, i32) {
    %c0_i32 = arith.constant 0 : i32
    %c0_i32_0 = arith.constant 0 : i32
    %c0_i32_1 = arith.constant 0 : i32
    return %c0_i32, %c0_i32_0 : i32, i32
  }
  func.func @transform_6(%arg0: i32) -> (i32, i32) {
    %c0_i32 = arith.constant 0 : i32
    %c0_i32_0 = arith.constant 0 : i32
    %c0_i32_1 = arith.constant 0 : i32
    return %c0_i32, %c0_i32_0 : i32, i32
  }
  func.func @transform_7(%arg0: i32) -> (i32, i32) {
    %c0_i32 = arith.constant 0 : i32
    %c0_i32_0 = arith.constant 0 : i32
    %c0_i32_1 = arith.constant 0 : i32
    return %c0_i32, %c0_i32_0 : i32, i32
  }
  func.func @transform_8(%arg0: i32) -> (i32, i32) {
    %c0_i32 = arith.constant 0 : i32
    %c0_i32_0 = arith.constant 0 : i32
    %c0_i32_1 = arith.constant 0 : i32
    return %c0_i32, %c0_i32_0 : i32, i32
  }
  func.func @transform_9(%arg0: i32) -> (i32, i32, i32) {
    %c0_i32 = arith.constant 0 : i32
    %c0_i32_0 = arith.constant 0 : i32
    %c0_i32_1 = arith.constant 0 : i32
    return %arg0, %c0_i32, %c0_i32_0 : i32, i32, i32
  }
}

</mosaic_0001>

<bundles_post_ra>
// kernel: vgg_forward.1
= control target key start
LH: loop header
LB: loop body
LE: loop exit
PB: predicated region body
PF: predicated region fallthrough
CT: control target
= control target key end

     0   :  { %14 = vsyncpa [#allocation4], 0  ;;  %s3879_s0 = inlined_call_operand.vmem [shape: bf16[2,64,32], index: 0, kind: input, shape index: {}]   ;;  %s3880_s1 = inlined_call_operand.vmem [shape: bf16[32,32], index: 1, kind: input, shape index: {}]   ;;  %s3881_s2 = inlined_call_operand.vmem [shape: f32[1,32], index: 2, kind: input, shape index: {}]   ;;  %s3882_s3 = inlined_call_operand.vmem [shape: f32[9,32], index: 3, kind: input, shape index: {}]   ;;  %s3883_s4 = inlined_call_operand.vmem [shape: f32[1,32], index: 4, kind: input, shape index: {}]   ;;  %s3884_s5 = inlined_call_operand.vmem [shape: bf16[32,1024], index: 5, kind: input, shape index: {}]   ;;  %s3885_s6 = inlined_call_operand.vmem [shape: f32[1,1024], index: 6, kind: input, shape index: {}]   ;;  %s3886_s7 = inlined_call_operand.vmem [shape: bf16[1024,128], index: 7, kind: input, shape index: {}]   ;;  %s3887_s8 = inlined_call_operand.vmem [shape: f32[1,128], index: 8, kind: input, shape index: {}]   ;;  %s3888_s9 = inlined_call_operand.hbm [shape: f32[2,1,128], index: 9, kind: output, shape index: {}]  }
   0x1   :  { %16 = vsyncpa [#allocation4 + $0x1], 0  ;;  %s2861_s30 = smov 0   ;;  %s2863_s10 = smov 0  }
   0x2   :  { %s2865_s11 = smov 0   ;;  %s2867_s12 = smov 0  }
   0x3 LB: > { %s2882_s13 = sadd.s32 4294967295, %s2808_s12   ;;  %s2224_s14 = sadd.s32 4294967294, %s2808_s12   ;;  %s2808_s12 = sphi %s2867_s12, %s3894_s12   ;;  %s2804_s11 = sphi %s2865_s11, %s3893_s11   ;;  %s2800_s10 = sphi %s2863_s10, %s3892_s10   ;;  %s2796_s30 = sphi %s2861_s30, %s3891_s30  }
   0x4   : > { %s2886_s15 = sadd.s32 1, %s2808_s12   ;;  %s223_s16 = sadd.s32 1, %s2804_s11 }
   0x5   : > { %s220_s17 = ssub.s32 %s2808_s12, %s2886_s15  ;;  %p233_p0 = scmp.ne.s32.totalorder %s2804_s11, %s2800_s10 }
   0x6   : > { %p221_p1 = scmp.eq.s32.totalorder %s220_s17, 0  ;;  %p234_p2 = scmp.eq.s32.totalorder %s2882_s13, 1 }
   0x7   : > { %p239_p3 = scmp.ne.s32.totalorder %s2800_s10, %s2796_s30  ;;  %p240_p4 = scmp.eq.s32.totalorder %s2224_s14, 1 }
   0x8   : > { %s2897_s18 = scalar_select %p221_p1, %s2804_s11, %s223_s16  }
   0x9   : > { %p2899_p5 = por %p234_p2, %p233_p0  ;;  %p2903_p6 = por %p240_p4, %p239_p3 }
   0xa   : > { %p2227_p7 = scmp.ge.s32.totalorder %s2808_s12, 1  ;;  %p290_p8 = scmp.lt.s32.totalorder %s2808_s12, 3 }
   0xc   : > { %p291_p9 = pnand %p2227_p7, %p290_p8 }
   0xd   : > { %p325_p10 = scmp.lt.s32.totalorder (!%p291_p9), %s2882_s13, 1  ;;  %s323_s14 = sand.u32 (!%p291_p9), 1, %s2800_s10  }
   0xe   : > { %294 = sbr.rel (%p291_p9) target bundleno = 684 (0x2ac), region = 56  ;;  %s2165_s21 = scalar_lea.hbm (!%p291_p9), %s3888_s9, %s2882_s13 }
   0xf   : > { %s324_s22 = scalar_lea.vmem (!%p291_p9), [#allocation3], %s323_s14  ;;  %s2169_s24 = sshll.u32 (!%p291_p9), %s2165_s21, 4  ;;  %s2170_s24 = int_to_ptr.hbm [resolvable:$true] %s2169_s24 }
  0x10   : > { %s2167_s23 = sshll.u32 (!%p291_p9), %s324_s22, 4  ;;  %s2168_s23 = int_to_ptr.vmem [resolvable:$true] %s2167_s23 }
  0x13   : > { %v2618_v0 = vld [vmem:[%s3880_s1 + $0x8] sm:$0xff]  ;;  %v2617_v1 = vld [vmem:[%s3880_s1] sm:$0xff]  ;;  %s326_s25 = scalar_select %p325_p10, %s2882_s13, 1  ;;  %vm379_vm0 = vcmask 261120   ;;  %vm430_vm1 = vcmask 254976   ;;  %v2810_v6 = vmov 0.0  }
  0x14   : > { %398 = vmatpush.bf16.msra.mxu0 %v2618_v0  ;;  %2699 = vmatpush.bf16.msra.mxu2 %v2618_v0  ;;  %431 = vst.msk [vmem:[#allocation2 + $0x8] sm:$0x3] %vm430_vm1, %v2810_v6  ;;  %v2947_v7 = vld [vmem:[%s3882_s3] sm:$0xff]  ;;  %vm531_vm2 = vcmask 1046528   ;;  %v2628_v28 = vld [vmem:[%s3884_s5 + $0x4c] sm:$0xf] }
  0x15   : > { %s2612_s26 = sshll.u32 %s326_s25, 5  ;;  %432 = vst.msk [vmem:[#allocation2 + $0x10] sm:$0xff] %vm379_vm0, %v2810_v6  ;;  %v2950_v8 = vperm.slane %v2947_v7, 1  ;;  %v2955_v11 = vld [vmem:[%s3881_s2] ss:$0 sm:$0xff]  ;;  %v2958_v12 = vperm.slane %v2947_v7, 2 }
  0x16   : > { %s329_s29 = scalar_lea.vmem %s3879_s0, %s2612_s26  ;;  %433 = vst.msk [vmem:[#allocation2 + $0x18] sm:$0x3] %vm430_vm1, %v2810_v6  ;;  %v2964_v17 = vperm.slane %v2947_v7, 0  ;;  %v2292_v22 = vld [vmem:[%s3884_s5 + $0x40] sm:$0xf]  ;;  %vm605_vm3 = vcmask 1045504  }
  0x17   : > { %v2613_v2 = vld [vmem:[%s329_s29] sm:$0xff]  ;;  %v2616_v3 = vld [vmem:[%s329_s29 + $0x18] sm:$0xff]  ;;  %v2614_v4 = vld [vmem:[%s329_s29 + $0x8] sm:$0xff]  ;;  %449 = vst.msk [vmem:[#allocation2 + $0x98] sm:$0x3] %vm430_vm1, %v2810_v6  ;;  %v3010_v50 = vperm.slane %v2947_v7, 4 }
  0x18   : > { %399 = vmatpush.bf16.msra.mxu0 %v2617_v1  ;;  %2700 = vmatpush.bf16.msra.mxu2 %v2617_v1  ;;  %v2615_v5 = vld [vmem:[%s329_s29 + $0x10] sm:$0xff]  ;;  %429 = vst.msk [vmem:[#allocation2] sm:$0xff] %vm379_vm0, %v2810_v6  ;;  %v2631_v23 = vld [vmem:[%s3884_s5 + $0x5c] sm:$0xf0]  ;;  %v2627_v26 = vld [vmem:[%s3884_s5 + $0x44] sm:$0xf] }
  0x19   : > { %434 = vst.msk [vmem:[#allocation2 + $0x20] sm:$0xff] %vm379_vm0, %v2810_v6  ;;  %v2293_v25 = vor.u32 %v2631_v23, %v2292_v22  ;;  %v2294_v27 = vld [vmem:[%s3884_s5 + $0x60] sm:$0xf0]  ;;  %v2302_v30 = vld [vmem:[%s3884_s5 + $0x68] sm:$0xf0]  ;;  %v3013_v52 = vperm.slane %v2947_v7, 3 }
  0x1a   : > { %435 = vst.msk [vmem:[#allocation2 + $0x28] sm:$0x3] %vm430_vm1, %v2810_v6  ;;  %v2297_v29 = vor.u32 %v2627_v26, %v2294_v27  ;;  %v2305_v33 = vor.u32 %v2628_v28, %v2302_v30  ;;  %v2260_v37 = vld [vmem:[%s3884_s5] sm:$0xf]  ;;  %v2619_v39 = vld [vmem:[%s3884_s5 + $0x4] sm:$0xf] }
  0x1b   : > { %2254 = vmatmul.msk.bf16.vlgmr.msra.gmra.mxu0 %vm379_vm0, %v2613_v2  ;;  %2257 = vmatmul.msk.bf16.vlgmr.msra.gmra.mxu2 %vm379_vm0, %v2616_v3  ;;  %436 = vst.msk [vmem:[#allocation2 + $0x30] sm:$0xff] %vm379_vm0, %v2810_v6  ;;  %v460_v9 = vld [vmem:[#allocation2 + $0x8] sm:$0x3]  ;;  %v2623_v38 = vld [vmem:[%s3884_s5 + $0x1c] sm:$0xf0]  ;;  %v3018_v57 = vperm.slane %v2947_v7, 5 }
  0x1c   : > { %437 = vst.msk [vmem:[#allocation2 + $0x38] sm:$0x3] %vm430_vm1, %v2810_v6  ;;  %v500_v13 = vmul.f32 %v2950_v8, %v460_v9  ;;  %v574_v20 = vmul.f32 %v2958_v12, %v460_v9  ;;  %1128 = vmatpush.bf16.msra.mxu1 %v2293_v25  ;;  %2701 = vmatpush.bf16.msra.mxu3 %v2293_v25  ;;  %v2262_v43 = vld [vmem:[%s3884_s5 + $0x20] sm:$0xf0]  ;;  %v2620_v44 = vld [vmem:[%s3884_s5 + $0xc] sm:$0xf] }
  0x1d   : > { %438 = vst.msk [vmem:[#allocation2 + $0x40] sm:$0xff] %vm379_vm0, %v2810_v6  ;;  %1157 = vmatpush.bf16.msrb.mxu2 %v2297_v29  ;;  %1215 = vmatpush.bf16.msrb.mxu0 %v2305_v33  ;;  %v2261_v42 = vor.u32 %v2623_v38, %v2260_v37  ;;  %v2270_v45 = vld [vmem:[%s3884_s5 + $0x28] sm:$0xf0]  ;;  %v2265_v48 = vor.u32 %v2619_v39, %v2262_v43  ;;  %v3024_v61 = vperm.slane %v2947_v7, 7  ;;  %s2157_s25 = scalar_lea.sflag [#allocation4], %s323_s14  ;;  %s2760_s26 = sshra.s32 %s2170_s24, 4  ;;  %s2761_s26 = int_to_ptr.hbm [resolvable:$true] %s2760_s26 }
  0x1e   : > { %439 = vst.msk [vmem:[#allocation2 + $0x48] sm:$0x3] %vm430_vm1, %v2810_v6  ;;  %v533_v18 = vrot.slane %v500_v13, 1  ;;  %v607_v35 = vrot.slane %v574_v20, 2  ;;  %v2273_v49 = vor.u32 %v2620_v44, %v2270_v45  ;;  %s2762_s27 = scalar_lea.hbm %s2761_s26, 1  ;;  %s2766_s29 = scalar_lea.hbm %s3888_s9, 2 }
  0x1f   : > { %440 = vst.msk [vmem:[#allocation2 + $0x50] sm:$0xff] %vm379_vm0, %v2810_v6  ;;  %v459_v10 = vld [vmem:[#allocation2] sm:$0xff]  ;;  %p2763_p11 = scmp.ne.s32.totalorder %s2761_s26, %s2762_s27  ;;  %p2767_p0 = scmp.lt.s32.totalorder %s2761_s26, %s3888_s9 }
  0x20   : > { %441 = vst.msk [vmem:[#allocation2 + $0x58] sm:$0x3] %vm430_vm1, %v2810_v6  ;;  %v499_v14 = vmul.f32 %v2950_v8, %v459_v10  ;;  %v573_v19 = vmul.f32 %v2958_v12, %v459_v10  ;;  %v482_v31 = vmul.f32 %v2964_v17, %v459_v10  ;;  %1129 = vmatpush.bf16.msra.mxu1 %v2261_v42  ;;  %p2768_p1 = scmp.lt.s32.totalorder %s2766_s29, %s2762_s27 }
  0x21   : > { %442 = vst.msk [vmem:[#allocation2 + $0x60] sm:$0xff] %vm379_vm0, %v2810_v6  ;;  %2702 = vmatpush.bf16.msra.mxu3 %v2261_v42  ;;  %1158 = vmatpush.bf16.msrb.mxu2 %v2265_v48  ;;  %p2764_p12 = pnand %p2763_p11, %p2899_p5 }
  0x22   : > { %443 = vst.msk [vmem:[#allocation2 + $0x68] sm:$0x3] %vm430_vm1, %v2810_v6  ;;  %v532_v24 = vrot.slane %v499_v14, 1  ;;  %v606_v34 = vrot.slane %v573_v19, 2  ;;  %1216 = vmatpush.bf16.msrb.mxu0 %v2273_v49  ;;  %p2769_p2 = por %p2768_p1, %p2767_p0 }
  0x23   : > { %444 = vst.msk [vmem:[#allocation2 + $0x70] sm:$0xff] %vm379_vm0, %v2810_v6  ;;  %p2765_p13 = pneg %p2764_p12 }
  0x24   : > { %445 = vst.msk [vmem:[#allocation2 + $0x78] sm:$0x3] %vm430_vm1, %v2810_v6  ;;  %v534_v40 = vsel %vm531_vm2, %v532_v24, %v533_v18  ;;  %v608_v54 = vsel %vm605_vm3, %v606_v34, %v607_v35  ;;  %v3052_v35 = vperm.slane %v2947_v7, 6 }
  0x25   : > { %446 = vst.msk [vmem:[#allocation2 + $0x80] sm:$0xff] %vm379_vm0, %v2810_v6  ;;  %v564_v51 = vadd.f32 %v534_v40, %v482_v31  ;;  %p2770_p3 = pnand %p2769_p2, %p2765_p13 }
  0x26   : > { %447 = vst.msk [vmem:[#allocation2 + $0x88] sm:$0x3] %vm430_vm1, %v2810_v6 }
  0x27   : > { %448 = vst.msk [vmem:[#allocation2 + $0x90] sm:$0xff] %vm379_vm0, %v2810_v6  ;;  %v638_v1 = vadd.f32 %v608_v54, %v564_v51 }
  0x2b   : > { %2255 = vmatmul.msk.bf16.gmra.mxu0 %vm379_vm0, %v2614_v4 }
  0x3b   : > { %2256 = vmatmul.msk.bf16.gmra.mxu0 %vm379_vm0, %v2615_v5 }
  0x98   : > { %v401_v15 = vpop.f32.mrf.mxu0 }
  0x99   : > { %v402_v16 = vadd.f32 %v2955_v11, %v401_v15 }
  0x9b   : > { %v421_v21 = vmax.f32 %v402_v16, 0.0 }
  0x9d   : > { %451 = vst.msk [vmem:[#allocation2 + $0x11] sm:$0xff] %vm379_vm0, %v421_v21 }
  0x9e   : > { %v416_v32 = vpop.f32.mrf.mxu2 }
  0x9f   : > { %v417_v36 = vadd.f32 %v2955_v11, %v416_v32 }
  0xa0   : > { %v403_v41 = vpop.f32.mrf.mxu0 }
  0xa1   : > { %v404_v46 = vadd.f32 %v2955_v11, %v403_v41  ;;  %v427_v47 = vmax.f32 %v417_v36, 0.0 }
  0xa3   : > { %v422_v53 = vmax.f32 %v404_v46, 0.0  ;;  %457 = vst.msk [vmem:[#allocation2 + $0x71] sm:$0xff] %vm379_vm0, %v427_v47 }
  0xa4   : > { %v461_v55 = vld [vmem:[#allocation2 + $0x10] sm:$0xff]  ;;  %v462_v56 = vld [vmem:[#allocation2 + $0x18] sm:$0x3] }
  0xa5   : > { %v501_v58 = vmul.f32 %v2950_v8, %v461_v55  ;;  %v502_v59 = vmul.f32 %v2950_v8, %v462_v56  ;;  %v575_v60 = vmul.f32 %v2958_v12, %v461_v55  ;;  %452 = vst.msk [vmem:[#allocation2 + $0x21] sm:$0xff] %vm379_vm0, %v422_v53  ;;  %v576_v62 = vmul.f32 %v2958_v12, %v462_v56 }
  0xa6   : > { %v665_v63 = vmul.f32 %v3010_v50, %v462_v56  ;;  %v418_v0 = vpop.f32.mrf.mxu2  ;;  %v647_v2 = vmul.f32 %v3013_v52, %v461_v55  ;;  %v483_v9 = vmul.f32 %v2964_v17, %v461_v55  ;;  %v738_v14 = vmul.f32 %v3018_v57, %v462_v56 }
  0xa7   : > { %v535_v3 = vrot.slane %v501_v58, 1  ;;  %v536_v4 = vrot.slane %v502_v59, 1  ;;  %v609_v5 = vrot.slane %v575_v60, 2  ;;  %v419_v6 = vadd.f32 %v2955_v11, %v418_v0 }
  0xa8   : > { %v610_v10 = vrot.slane %v576_v62, 2  ;;  %v697_v13 = vrot.slane %v665_v63, 1  ;;  %v406_v15 = vpop.f32.mrf.mxu0  ;;  %v664_v20 = vmul.f32 %v3010_v50, %v461_v55  ;;  %v655_v24 = vadd.f32 %v647_v2, %v638_v1 }
  0xa9   : > { %v537_v16 = vsel %vm531_vm2, %v535_v3, %v536_v4  ;;  %v407_v18 = vadd.f32 %v2955_v11, %v406_v15  ;;  %v428_v19 = vmax.f32 %v419_v6, 0.0  ;;  %v737_v25 = vmul.f32 %v3018_v57, %v461_v55 }
  0xaa   : > { %v3036_v21 = vld [vmem:[#allocation2 + $0x78] sm:$0x3]  ;;  %v565_v22 = vadd.f32 %v537_v16, %v483_v9  ;;  %v611_v23 = vsel %vm605_vm3, %v609_v5, %v610_v10  ;;  %v696_v29 = vrot.slane %v664_v20, 1  ;;  %v770_v30 = vrot.slane %v738_v14, 2  ;;  %v3094_v5 = vld [vmem:[%s3882_s3 + $0x8] ss:$0 sm:$0xff] }
  0xab   : > { %v423_v26 = vmax.f32 %v407_v18, 0.0  ;;  %v3042_v27 = vmul.f32 %v2950_v8, %v3036_v21  ;;  %v3046_v28 = vmul.f32 %v2958_v12, %v3036_v21  ;;  %458 = vst.msk [vmem:[#allocation2 + $0x81] sm:$0xff] %vm379_vm0, %v428_v19  ;;  %v769_v34 = vrot.slane %v737_v25, 2 }
  0xac   : > { %v3049_v31 = vld [vmem:[#allocation2 + $0x20] sm:$0xff]  ;;  %v464_v32 = vld [vmem:[#allocation2 + $0x28] sm:$0x3]  ;;  %v639_v33 = vadd.f32 %v611_v23, %v565_v22  ;;  %v698_v42 = vsel %vm531_vm2, %v696_v29, %v697_v13 }
  0xad   : > { %v3055_v36 = vmul.f32 %v2950_v8, %v464_v32  ;;  %v3058_v37 = vmul.f32 %v2958_v12, %v464_v32  ;;  %453 = vst.msk [vmem:[#allocation2 + $0x31] sm:$0xff] %vm379_vm0, %v423_v26  ;;  %v554_v38 = vrot.slane %v3042_v27, 1  ;;  %v628_v39 = vrot.slane %v3046_v28, 2 }
  0xae   : > { %v648_v40 = vmul.f32 %v3013_v52, %v3049_v31  ;;  %v666_v41 = vmul.f32 %v3010_v50, %v3049_v31  ;;  %v667_v7 = vmul.f32 %v3010_v50, %v464_v32  ;;  %v728_v45 = vadd.f32 %v698_v42, %v655_v24 }
  0xaf   : > { %v539_v43 = vrot.slane %v3055_v36, 1  ;;  %v613_v44 = vrot.slane %v3058_v37, 2  ;;  %v739_v46 = vmul.f32 %v3018_v57, %v3049_v31  ;;  %v740_v53 = vmul.f32 %v3018_v57, %v464_v32 }
  0xb0   : > { %v408_v47 = vpop.f32.mrf.mxu0  ;;  %v656_v48 = vadd.f32 %v648_v40, %v639_v33  ;;  %v699_v49 = vrot.slane %v666_v41, 1  ;;  %v700_v51 = vrot.slane %v667_v7, 1  ;;  %v771_v55 = vsel %vm605_vm3, %v769_v34, %v770_v30 }
  0xb1   : > { %v409_v54 = vadd.f32 %v2955_v11, %v408_v47  ;;  %v772_v56 = vrot.slane %v739_v46, 2  ;;  %v810_v58 = vmul.f32 %v3052_v35, %v3049_v31  ;;  %v773_v62 = vrot.slane %v740_v53, 2 }
  0xb2   : > { %v3078_v59 = vld [vmem:[#allocation2 + $0x88] sm:$0x3]  ;;  %v701_v60 = vsel %vm531_vm2, %v699_v49, %v700_v51  ;;  %v801_v63 = vadd.f32 %v771_v55, %v728_v45  ;;  %v827_v0 = vmul.f32 %v3024_v61, %v3049_v31  ;;  %v828_v14 = vmul.f32 %v3024_v61, %v464_v32 }
  0xb3   : > { %v424_v1 = vmax.f32 %v409_v54, 0.0  ;;  %v3085_v2 = vmul.f32 %v3010_v50, %v3078_v59  ;;  %v3089_v3 = vmul.f32 %v3018_v57, %v3078_v59  ;;  %v729_v4 = vadd.f32 %v701_v60, %v656_v48 }
  0xb4   : > { %v3096_v6 = vld [vmem:[#allocation2 + $0x30] sm:$0xff]  ;;  %v3098_v9 = vld [vmem:[#allocation2 + $0x38] sm:$0x3]  ;;  %v774_v10 = vsel %vm605_vm3, %v772_v56, %v773_v62  ;;  %v818_v13 = vadd.f32 %v810_v58, %v801_v63  ;;  %v859_v15 = vrot.slane %v827_v0, 1  ;;  %v860_v30 = vrot.slane %v828_v14, 1 }
  0xb5   : > { %v506_v16 = vmul.f32 %v2950_v8, %v3098_v9  ;;  %v3106_v18 = vmul.f32 %v2958_v12, %v3098_v9  ;;  %454 = vst.msk [vmem:[#allocation2 + $0x41] sm:$0xff] %vm379_vm0, %v424_v1  ;;  %v718_v19 = vrot.slane %v3085_v2, 1  ;;  %v791_v20 = vrot.slane %v3089_v3, 2  ;;  %v2632_v3 = vld [vmem:[%s3884_s5 + $0x64] sm:$0xf0] }
  0xb6   : > { %v802_v22 = vadd.f32 %v774_v10, %v729_v4  ;;  %v811_v23 = vmul.f32 %v3052_v35, %v3096_v6  ;;  %v829_v24 = vmul.f32 %v3024_v61, %v3096_v6  ;;  %v830_v25 = vmul.f32 %v3024_v61, %v3098_v9 }
  0xb7   : > { %v542_v26 = vrot.slane %v506_v16, 1  ;;  %v616_v29 = vrot.slane %v3106_v18, 2  ;;  %v900_v33 = vmul.f32 %v3094_v5, %v3049_v31  ;;  %v901_v42 = vmul.f32 %v3094_v5, %v464_v32  ;;  %v3131_v32 = vld [vmem:[%s3883_s4] ss:$0 sm:$0xff] }
  0xb8   : > { %v411_v34 = vpop.f32.mrf.mxu0  ;;  %v819_v40 = vadd.f32 %v811_v23, %v802_v22  ;;  %v862_v41 = vrot.slane %v829_v24, 1  ;;  %v863_v7 = vrot.slane %v830_v25, 1  ;;  %v861_v46 = vsel %vm531_vm2, %v859_v15, %v860_v30 }
  0xb9   : > { %v412_v45 = vadd.f32 %v2955_v11, %v411_v34  ;;  %v902_v47 = vmul.f32 %v3094_v5, %v3096_v6  ;;  %v903_v48 = vmul.f32 %v3094_v5, %v3098_v9  ;;  %v891_v51 = vadd.f32 %v861_v46, %v818_v13 }
  0xba   : > { %v864_v49 = vsel %vm531_vm2, %v862_v41, %v863_v7  ;;  %v932_v53 = vrot.slane %v900_v33, 2  ;;  %v933_v54 = vrot.slane %v901_v42, 2  ;;  %v484_v0 = vmul.f32 %v2964_v17, %v3049_v31 }
  0xbb   : > { %v425_v55 = vmax.f32 %v412_v45, 0.0  ;;  %v892_v56 = vadd.f32 %v864_v49, %v819_v40  ;;  %v935_v58 = vrot.slane %v902_v47, 2  ;;  %v936_v60 = vrot.slane %v903_v48, 2 }
  0xbc   : > { %v3133_v62 = vld [vmem:[#allocation2 + $0x48] sm:$0x3]  ;;  %v934_v63 = vsel %vm605_vm3, %v932_v53, %v933_v54  ;;  %v485_v1 = vmul.f32 %v2964_v17, %v3096_v6  ;;  %v503_v4 = vmul.f32 %v2950_v8, %v3049_v31  ;;  %v505_v18 = vmul.f32 %v2950_v8, %v3096_v6  ;;  %v3165_v45 = vld [vmem:[#allocation2 + $0x40] sm:$0xff] }
  0xbd   : > { %v3144_v10 = vmul.f32 %v2950_v8, %v3133_v62  ;;  %v3148_v13 = vmul.f32 %v2958_v12, %v3133_v62  ;;  %455 = vst.msk [vmem:[#allocation2 + $0x51] sm:$0xff] %vm379_vm0, %v425_v55  ;;  %v937_v14 = vsel %vm605_vm3, %v935_v58, %v936_v60  ;;  %v964_v15 = vadd.f32 %v934_v63, %v891_v51 }
  0xbe   : > { %v965_v16 = vadd.f32 %v937_v14, %v892_v56  ;;  %v538_v22 = vrot.slane %v503_v4, 1  ;;  %v577_v23 = vmul.f32 %v2958_v12, %v3049_v31  ;;  %v579_v33 = vmul.f32 %v2958_v12, %v3096_v6 }
  0xbf   : > { %v545_v24 = vrot.slane %v3144_v10, 1  ;;  %v619_v25 = vrot.slane %v3148_v13, 2  ;;  %v976_v30 = vadd.f32 %v3131_v32, %v964_v15  ;;  %v541_v7 = vrot.slane %v505_v18, 1 }
  0xc0   : > { %v413_v34 = vpop.f32.mrf.mxu0  ;;  %v977_v40 = vadd.f32 %v3131_v32, %v965_v16  ;;  %v540_v41 = vsel %vm531_vm2, %v538_v22, %v539_v43  ;;  %v612_v42 = vrot.slane %v577_v23, 2  ;;  %v615_v48 = vrot.slane %v579_v33, 2 }
  0xc1   : > { %v414_v31 = vadd.f32 %v2955_v11, %v413_v34  ;;  %v984_v46 = vmax.f32 %v976_v30, 0.0  ;;  %v566_v47 = vadd.f32 %v540_v41, %v484_v0  ;;  %v543_v51 = vsel %vm531_vm2, %v541_v7, %v542_v26 }
  0xc2   : > { %v985_v49 = vmax.f32 %v977_v40, 0.0  ;;  %v614_v53 = vsel %vm605_vm3, %v612_v42, %v613_v44  ;;  %v649_v36 = vmul.f32 %v3013_v52, %v3096_v6  ;;  %v567_v54 = vadd.f32 %v543_v51, %v485_v1 }
  0xc3   : > { %v426_v43 = vmax.f32 %v414_v31, 0.0  ;;  %v617_v55 = vsel %vm605_vm3, %v615_v48, %v616_v29  ;;  %v640_v56 = vadd.f32 %v614_v53, %v566_v47  ;;  %v650_v60 = vmul.f32 %v3013_v52, %v3165_v45 }
  0xc4   : > { %v3175_v58 = vld [vmem:[#allocation2 + $0x58] sm:$0x3]  ;;  %v3177_v11 = vpack.c.bf16 %v985_v49, %v984_v46  ;;  %v668_v37 = vmul.f32 %v3010_v50, %v3096_v6  ;;  %v669_v44 = vmul.f32 %v3010_v50, %v3098_v9  ;;  %v641_v63 = vadd.f32 %v617_v55, %v567_v54  ;;  %v3202_v16 = vld [vmem:[#allocation2 + $0x50] sm:$0xff] }
  0xc5   : > { %v3187_v26 = vmul.f32 %v2950_v8, %v3175_v58  ;;  %v3191_v29 = vmul.f32 %v2958_v12, %v3175_v58  ;;  %456 = vst.msk [vmem:[#allocation2 + $0x61] sm:$0xff] %vm379_vm0, %v426_v43  ;;  %v657_v0 = vadd.f32 %v649_v36, %v640_v56  ;;  %v670_v1 = vmul.f32 %v3010_v50, %v3165_v45 }
  0xc6   : > { %2322 = vmatmul.msk.bf16.vlgmr.msra.gmra.mxu1 %vm379_vm0, %v3177_v11  ;;  %2326 = vmatmul.msk.bf16.vlgmr.msrb.gmra.mxu2 %vm379_vm0, %v3177_v11  ;;  %v671_v4 = vmul.f32 %v3010_v50, %v3133_v62  ;;  %v702_v14 = vrot.slane %v668_v37, 1  ;;  %v703_v15 = vrot.slane %v669_v44, 1  ;;  %v658_v23 = vadd.f32 %v650_v60, %v641_v63 }
  0xc7   : > { %v548_v18 = vrot.slane %v3187_v26, 1  ;;  %v622_v22 = vrot.slane %v3191_v29, 2  ;;  %2334 = vmatmul.msk.bf16.vlgmr.msrb.gmra.mxu0 %vm379_vm0, %v3177_v11  ;;  %v741_v30 = vmul.f32 %v3018_v57, %v3096_v6  ;;  %v705_v34 = vrot.slane %v670_v1, 1 }
  0xc8   : > { %v704_v33 = vsel %vm531_vm2, %v702_v14, %v703_v15  ;;  %v706_v40 = vrot.slane %v671_v4, 1  ;;  %v742_v41 = vmul.f32 %v3018_v57, %v3098_v9  ;;  %v743_v42 = vmul.f32 %v3018_v57, %v3165_v45 }
  0xc9   : > { %v730_v7 = vadd.f32 %v704_v33, %v657_v0  ;;  %v744_v31 = vmul.f32 %v3018_v57, %v3133_v62  ;;  %v775_v46 = vrot.slane %v741_v30, 2  ;;  %v812_v6 = vmul.f32 %v3052_v35, %v3165_v45 }
  0xca   : > { %v707_v47 = vsel %vm531_vm2, %v705_v34, %v706_v40  ;;  %v776_v48 = vrot.slane %v742_v41, 2  ;;  %v813_v49 = vmul.f32 %v3052_v35, %v3202_v16  ;;  %v778_v53 = vrot.slane %v743_v42, 2 }
  0xcb   : > { %v731_v51 = vadd.f32 %v707_v47, %v658_v23  ;;  %v779_v9 = vrot.slane %v744_v31, 2  ;;  %v831_v36 = vmul.f32 %v3024_v61, %v3165_v45  ;;  %v832_v55 = vmul.f32 %v3024_v61, %v3133_v62 }
  0xcc   : > { %v3224_v43 = vld [vmem:[#allocation2 + $0x68] sm:$0x3]  ;;  %v777_v54 = vsel %vm605_vm3, %v775_v46, %v776_v48  ;;  %v833_v56 = vmul.f32 %v3024_v61, %v3202_v16  ;;  %v834_v60 = vmul.f32 %v3024_v61, %v3175_v58  ;;  %v904_v42 = vmul.f32 %v3094_v5, %v3165_v45 }
  0xcd   : > { %v3235_v37 = vmul.f32 %v2950_v8, %v3224_v43  ;;  %v3239_v44 = vmul.f32 %v2958_v12, %v3224_v43  ;;  %v780_v63 = vsel %vm605_vm3, %v778_v53, %v779_v9  ;;  %v803_v0 = vadd.f32 %v777_v54, %v730_v7 }
  0xce   : > { %v804_v1 = vadd.f32 %v780_v63, %v731_v51  ;;  %v865_v4 = vrot.slane %v831_v36, 1  ;;  %v866_v14 = vrot.slane %v832_v55, 1  ;;  %v868_v15 = vrot.slane %v833_v56, 1  ;;  %v3260_v55 = vld [vmem:[#allocation2 + $0x60] sm:$0xff] }
  0xcf   : > { %v551_v23 = vrot.slane %v3235_v37, 1  ;;  %v625_v30 = vrot.slane %v3239_v44, 2  ;;  %v820_v33 = vadd.f32 %v812_v6, %v803_v0  ;;  %v869_v34 = vrot.slane %v834_v60, 1 }
  0xd0   : > { %v821_v40 = vadd.f32 %v813_v49, %v804_v1  ;;  %v867_v41 = vsel %vm531_vm2, %v865_v4, %v866_v14  ;;  %v905_v31 = vmul.f32 %v3094_v5, %v3133_v62  ;;  %v906_v47 = vmul.f32 %v3094_v5, %v3202_v16 }
  0xd1   : > { %v870_v7 = vsel %vm531_vm2, %v868_v15, %v869_v34  ;;  %v893_v46 = vadd.f32 %v867_v41, %v820_v33  ;;  %v907_v48 = vmul.f32 %v3094_v5, %v3175_v58  ;;  %v938_v51 = vrot.slane %v904_v42, 2 }
  0xd2   : > { %v894_v6 = vadd.f32 %v870_v7, %v821_v40  ;;  %v939_v49 = vrot.slane %v905_v31, 2  ;;  %v486_v53 = vmul.f32 %v2964_v17, %v3165_v45  ;;  %v941_v9 = vrot.slane %v906_v47, 2 }
  0xd3   : > { %v942_v36 = vrot.slane %v907_v48, 2  ;;  %v487_v62 = vmul.f32 %v2964_v17, %v3202_v16  ;;  %v507_v54 = vmul.f32 %v2950_v8, %v3165_v45  ;;  %v509_v60 = vmul.f32 %v2950_v8, %v3202_v16 }
  0xd4   : > { %v940_v56 = vsel %vm605_vm3, %v938_v51, %v939_v49  ;;  %v581_v63 = vmul.f32 %v2958_v12, %v3165_v45  ;;  %v583_v0 = vmul.f32 %v2958_v12, %v3202_v16  ;;  %v651_v15 = vmul.f32 %v3013_v52, %v3202_v16 }
  0xd5   : > { %v943_v1 = vsel %vm605_vm3, %v941_v9, %v942_v36  ;;  %v966_v4 = vadd.f32 %v940_v56, %v893_v46  ;;  %v544_v14 = vrot.slane %v507_v54, 1  ;;  %v547_v34 = vrot.slane %v509_v60, 1 }
  0xd6   : > { %v967_v33 = vadd.f32 %v943_v1, %v894_v6  ;;  %v618_v40 = vrot.slane %v581_v63, 2  ;;  %v621_v41 = vrot.slane %v583_v0, 2  ;;  %v652_v31 = vmul.f32 %v3013_v52, %v3260_v55 }
  0xd7   : > { %v978_v42 = vadd.f32 %v3131_v32, %v966_v4  ;;  %v546_v45 = vsel %vm531_vm2, %v544_v14, %v545_v24  ;;  %v672_v7 = vmul.f32 %v3010_v50, %v3202_v16  ;;  %v549_v47 = vsel %vm531_vm2, %v547_v34, %v548_v18 }
  0xd8   : > { %v979_v46 = vadd.f32 %v3131_v32, %v967_v33  ;;  %v568_v48 = vadd.f32 %v546_v45, %v486_v53  ;;  %v620_v6 = vsel %vm605_vm3, %v618_v40, %v619_v25  ;;  %v569_v51 = vadd.f32 %v549_v47, %v487_v62  ;;  %v3312_v33 = vld [vmem:[#allocation2 + $0x70] sm:$0xff] }
  0xd9   : > { %v986_v10 = vmax.f32 %v978_v42, 0.0  ;;  %v623_v24 = vsel %vm605_vm3, %v621_v41, %v622_v22  ;;  %v673_v49 = vmul.f32 %v3010_v50, %v3175_v58  ;;  %v674_v26 = vmul.f32 %v3010_v50, %v3260_v55 }
  0xda   : > { %v987_v9 = vmax.f32 %v979_v46, 0.0  ;;  %v642_v36 = vadd.f32 %v620_v6, %v568_v48  ;;  %v675_v18 = vmul.f32 %v3010_v50, %v3224_v43  ;;  %v643_v13 = vadd.f32 %v623_v24, %v569_v51 }
  0xdb   : > { %v708_v53 = vrot.slane %v672_v7, 1  ;;  %v709_v25 = vrot.slane %v673_v49, 1  ;;  %v745_v62 = vmul.f32 %v3018_v57, %v3202_v16  ;;  %v711_v54 = vrot.slane %v674_v26, 1 }
  0xdc   : > { %v3298_v29 = vpack.c.bf16 %v987_v9, %v986_v10  ;;  %v659_v22 = vadd.f32 %v651_v15, %v642_v36  ;;  %v712_v56 = vrot.slane %v675_v18, 1  ;;  %v660_v60 = vadd.f32 %v652_v31, %v643_v13 }
  0xdd   : > { %v710_v63 = vsel %vm531_vm2, %v708_v53, %v709_v25  ;;  %v746_v0 = vmul.f32 %v3018_v57, %v3175_v58  ;;  %v747_v1 = vmul.f32 %v3018_v57, %v3260_v55  ;;  %v748_v14 = vmul.f32 %v3018_v57, %v3224_v43 }
  0xde   : > { %2323 = vmatmul.msk.bf16.gmra.mxu1 %vm379_vm0, %v3298_v29  ;;  %2327 = vmatmul.msk.bf16.gmra.mxu2 %vm379_vm0, %v3298_v29  ;;  %v713_v16 = vsel %vm531_vm2, %v711_v54, %v712_v56  ;;  %v732_v4 = vadd.f32 %v710_v63, %v659_v22  ;;  %v781_v15 = vrot.slane %v745_v62, 2  ;;  %v814_v41 = vmul.f32 %v3052_v35, %v3260_v55 }
  0xdf   : > { %2335 = vmatmul.msk.bf16.gmra.mxu0 %vm379_vm0, %v3298_v29  ;;  %v733_v58 = vadd.f32 %v713_v16, %v660_v60  ;;  %v782_v34 = vrot.slane %v746_v0, 2  ;;  %v784_v40 = vrot.slane %v747_v1, 2  ;;  %v785_v42 = vrot.slane %v748_v14, 2  ;;  %v3342_v16 = vld [vmem:[#allocation2 + $0x80] sm:$0xff] }
  0xe0   : > { %v815_v45 = vmul.f32 %v3052_v35, %v3312_v33  ;;  %v835_v31 = vmul.f32 %v3024_v61, %v3260_v55  ;;  %v836_v7 = vmul.f32 %v3024_v61, %v3224_v43  ;;  %v837_v47 = vmul.f32 %v3024_v61, %v3312_v33 }
  0xe1   : > { %v783_v46 = vsel %vm605_vm3, %v781_v15, %v782_v34  ;;  %v838_v48 = vmul.f32 %v3024_v61, %v3036_v21  ;;  %v908_v6 = vmul.f32 %v3094_v5, %v3260_v55  ;;  %v786_v10 = vsel %vm605_vm3, %v784_v40, %v785_v42 }
  0xe2   : > { %v805_v51 = vadd.f32 %v783_v46, %v732_v4  ;;  %v871_v24 = vrot.slane %v835_v31, 1  ;;  %v872_v49 = vrot.slane %v836_v7, 1  ;;  %v806_v9 = vadd.f32 %v786_v10, %v733_v58 }
  0xe3   : > { %v874_v36 = vrot.slane %v837_v47, 1  ;;  %v875_v26 = vrot.slane %v838_v48, 1  ;;  %v909_v18 = vmul.f32 %v3094_v5, %v3224_v43  ;;  %v910_v25 = vmul.f32 %v3094_v5, %v3312_v33 }
  0xe4   : > { %v822_v13 = vadd.f32 %v814_v41, %v805_v51  ;;  %v873_v53 = vsel %vm531_vm2, %v871_v24, %v872_v49  ;;  %v911_v62 = vmul.f32 %v3094_v5, %v3036_v21  ;;  %v823_v22 = vadd.f32 %v815_v45, %v806_v9 }
  0xe5   : > { %v876_v54 = vsel %vm531_vm2, %v874_v36, %v875_v26  ;;  %v944_v56 = vrot.slane %v908_v6, 2  ;;  %v945_v60 = vrot.slane %v909_v18, 2  ;;  %v947_v0 = vrot.slane %v910_v25, 2 }
  0xe6   : > { %v895_v63 = vadd.f32 %v873_v53, %v822_v13  ;;  %v948_v1 = vrot.slane %v911_v62, 2  ;;  %v488_v43 = vmul.f32 %v2964_v17, %v3260_v55  ;;  %v896_v4 = vadd.f32 %v876_v54, %v823_v22 }
  0xe7   : > { %v946_v14 = vsel %vm605_vm3, %v944_v56, %v945_v60  ;;  %v489_v15 = vmul.f32 %v2964_v17, %v3312_v33  ;;  %v511_v58 = vmul.f32 %v2950_v8, %v3260_v55  ;;  %v513_v41 = vmul.f32 %v2950_v8, %v3312_v33 }
  0xe8   : > { %v949_v34 = vsel %vm605_vm3, %v947_v0, %v948_v1  ;;  %v968_v40 = vadd.f32 %v946_v14, %v895_v63  ;;  %v585_v42 = vmul.f32 %v2958_v12, %v3260_v55  ;;  %v587_v7 = vmul.f32 %v2958_v12, %v3312_v33 }
  0xe9   : > { %v969_v45 = vadd.f32 %v949_v34, %v896_v4  ;;  %v550_v31 = vrot.slane %v511_v58, 1  ;;  %v653_v17 = vmul.f32 %v3013_v52, %v3312_v33  ;;  %v553_v47 = vrot.slane %v513_v41, 1 }
  0xea   : > { %v980_v46 = vadd.f32 %v3131_v32, %v968_v40  ;;  %v624_v48 = vrot.slane %v585_v42, 2  ;;  %v654_v6 = vmul.f32 %v3013_v52, %v3342_v16  ;;  %v627_v10 = vrot.slane %v587_v7, 2 }
  0xeb   : > { %v981_v8 = vadd.f32 %v3131_v32, %v969_v45  ;;  %v552_v55 = vsel %vm531_vm2, %v550_v31, %v551_v23  ;;  %v676_v12 = vmul.f32 %v3010_v50, %v3312_v33  ;;  %v555_v24 = vsel %vm531_vm2, %v553_v47, %v554_v38 }
  0xec   : > { %v988_v51 = vmax.f32 %v980_v46, 0.0  ;;  %v570_v49 = vadd.f32 %v552_v55, %v488_v43  ;;  %v626_v52 = vsel %vm605_vm3, %v624_v48, %v625_v30  ;;  %v571_v36 = vadd.f32 %v555_v24, %v489_v15  ;;  %v477_v30 = vld [vmem:[#allocation2 + $0x90] sm:$0xff] }
  0xed   : > { %v989_v9 = vmax.f32 %v981_v8, 0.0  ;;  %v629_v37 = vsel %vm605_vm3, %v627_v10, %v628_v39  ;;  %v677_v23 = vmul.f32 %v3010_v50, %v3036_v21  ;;  %v678_v27 = vmul.f32 %v3010_v50, %v3342_v16  ;;  %v478_v50 = vld [vmem:[#allocation2 + $0x98] sm:$0x3]  ;;  %v2624_v8 = vld [vmem:[%s3884_s5 + $0x24] sm:$0xf0] }
  0xee   : > { %v644_v26 = vadd.f32 %v626_v52, %v570_v49  ;;  %v714_v18 = vrot.slane %v676_v12, 1  ;;  %v749_v38 = vmul.f32 %v3018_v57, %v3312_v33  ;;  %v645_v13 = vadd.f32 %v629_v37, %v571_v36  ;;  %v2625_v55 = vld [vmem:[%s3884_s5 + $0x2c] sm:$0xf0]  ;;  %v2310_v49 = vld [vmem:[%s3884_s5 + $0x70] sm:$0xf0] }
  0xef   : > { %v3382_v44 = vpack.c.bf16 %v989_v9, %v988_v51  ;;  %v715_v53 = vrot.slane %v677_v23, 1  ;;  %v750_v28 = vmul.f32 %v3018_v57, %v3036_v21  ;;  %v717_v25 = vrot.slane %v678_v27, 1  ;;  %v2630_v23 = vld [vmem:[%s3884_s5 + $0x5c] sm:$0xf] }
  0xf0   : > { %v661_v39 = vadd.f32 %v653_v17, %v644_v26  ;;  %v751_v62 = vmul.f32 %v3018_v57, %v3342_v16  ;;  %v787_v22 = vrot.slane %v749_v38, 2  ;;  %v662_v33 = vadd.f32 %v654_v6, %v645_v13  ;;  %v2633_v17 = vld [vmem:[%s3884_s5 + $0x6c] sm:$0xf0]  ;;  %v2318_v26 = vld [vmem:[%s3884_s5 + $0x78] sm:$0xf0] }
  0xf1   : > { %2324 = vmatmul.msk.bf16.gmra.mxu1 %vm379_vm0, %v3382_v44  ;;  %2328 = vmatmul.msk.bf16.gmra.mxu2 %vm379_vm0, %v3382_v44  ;;  %v716_v54 = vsel %vm531_vm2, %v714_v18, %v715_v53  ;;  %v788_v56 = vrot.slane %v750_v28, 2  ;;  %v816_v21 = vmul.f32 %v3052_v35, %v3342_v16  ;;  %v719_v57 = vsel %vm531_vm2, %v717_v25, %v718_v19  ;;  %v2621_v38 = vld [vmem:[%s3884_s5 + $0x14] sm:$0xf]  ;;  %v2622_v25 = vld [vmem:[%s3884_s5 + $0x1c] sm:$0xf] }
  0xf2   : > { %2336 = vmatmul.msk.bf16.gmra.mxu0 %vm379_vm0, %v3382_v44  ;;  %v734_v60 = vadd.f32 %v716_v54, %v661_v39  ;;  %v790_v63 = vrot.slane %v751_v62, 2  ;;  %v817_v0 = vmul.f32 %v3052_v35, %v477_v30  ;;  %v735_v1 = vadd.f32 %v719_v57, %v662_v33  ;;  %v2300_v35 = vld [vmem:[%s3884_s5 + $0x48] sm:$0xf]  ;;  %v2286_v62 = vld [vmem:[%s3884_s5 + $0x38] sm:$0xf0] }
  0xf3   : > { %v789_v43 = vsel %vm605_vm3, %v787_v22, %v788_v56  ;;  %v839_v4 = vmul.f32 %v3024_v61, %v3342_v16  ;;  %v840_v14 = vmul.f32 %v3024_v61, %v3078_v59  ;;  %v841_v19 = vmul.f32 %v3024_v61, %v477_v30  ;;  %v2316_v57 = vld [vmem:[%s3884_s5 + $0x58] sm:$0xf] }
  0xf4   : > { %v792_v15 = vsel %vm605_vm3, %v790_v63, %v791_v20  ;;  %v807_v2 = vadd.f32 %v789_v43, %v734_v60  ;;  %v842_v58 = vmul.f32 %v3024_v61, %v478_v50  ;;  %v912_v42 = vmul.f32 %v3094_v5, %v3342_v16  ;;  %v2308_v20 = vld [vmem:[%s3884_s5 + $0x50] sm:$0xf]  ;;  %v2268_v16 = vld [vmem:[%s3884_s5 + $0x8] sm:$0xf]  ;;  %v2634_v60 = vld [vmem:[%s3884_s5 + $0x74] sm:$0xf0] }
  0xf5   : > { %v808_v34 = vadd.f32 %v792_v15, %v735_v1  ;;  %v877_v40 = vrot.slane %v839_v4, 1  ;;  %v878_v41 = vrot.slane %v840_v14, 1  ;;  %v880_v61 = vrot.slane %v841_v19, 1  ;;  %v2626_v14 = vld [vmem:[%s3884_s5 + $0x34] sm:$0xf0] }
  0xf6   : > { %v824_v45 = vadd.f32 %v816_v21, %v807_v2  ;;  %v881_v31 = vrot.slane %v842_v58, 1  ;;  %v913_v7 = vmul.f32 %v3094_v5, %v3078_v59  ;;  %v914_v48 = vmul.f32 %v3094_v5, %v477_v30  ;;  %v2276_v59 = vld [vmem:[%s3884_s5 + $0x10] sm:$0xf]  ;;  %v2278_v30 = vld [vmem:[%s3884_s5 + $0x30] sm:$0xf0] }
  0xf7   : > { %v825_v46 = vadd.f32 %v817_v0, %v808_v34  ;;  %v879_v47 = vsel %vm531_vm2, %v877_v40, %v878_v41  ;;  %v915_v6 = vmul.f32 %v3094_v5, %v478_v50  ;;  %v950_v51 = vrot.slane %v912_v42, 2  ;;  %v2629_v5 = vld [vmem:[%s3884_s5 + $0x54] sm:$0xf]  ;;  %v2642_v40 = vld [vmem:[%s3886_s7 + $0x38] sm:$0xff] }
  0xf8   : > { %v882_v10 = vsel %vm531_vm2, %v880_v61, %v881_v31  ;;  %v897_v12 = vadd.f32 %v879_v47, %v824_v45  ;;  %v951_v24 = vrot.slane %v913_v7, 2  ;;  %v953_v9 = vrot.slane %v914_v48, 2  ;;  %v2641_v41 = vld [vmem:[%s3886_s7 + $0x30] sm:$0xff]  ;;  %v2639_v31 = vld [vmem:[%s3886_s7 + $0x20] sm:$0xff] }
  0xf9   : > { %v898_v52 = vadd.f32 %v882_v10, %v825_v46  ;;  %v954_v36 = vrot.slane %v915_v6, 2  ;;  %v2301_v37 = vor.u32 %v2632_v3, %v2300_v35  ;;  %v2309_v18 = vor.u32 %v2633_v17, %v2308_v20  ;;  %v2640_v3 = vld [vmem:[%s3886_s7 + $0x28] sm:$0xff]  ;;  %v2637_v47 = vld [vmem:[%s3886_s7 + $0x10] sm:$0xff] }
  0xfa   : > { %v952_v27 = vsel %vm605_vm3, %v950_v51, %v951_v24  ;;  %v2269_v28 = vor.u32 %v2624_v8, %v2268_v16  ;;  %v2313_v39 = vor.u32 %v2629_v5, %v2310_v49  ;;  %v2277_v50 = vor.u32 %v2625_v55, %v2276_v59  ;;  %v2638_v16 = vld [vmem:[%s3886_s7 + $0x18] sm:$0xff]  ;;  %v3550_v8 = vld [vmem:[%s3885_s6] sm:$0xff]  ;;  %v2636_v49 = vld [vmem:[%s3886_s7 + $0x8] sm:$0xff] }
  0xfb   : > { %v955_v13 = vsel %vm605_vm3, %v953_v9, %v954_v36  ;;  %v970_v53 = vadd.f32 %v952_v27, %v897_v12  ;;  %1186 = vmatpush.bf16.msrb.mxu3 %v2301_v37  ;;  %1244 = vmatpush.bf16.msrb.mxu1 %v2309_v18  ;;  %v2321_v33 = vor.u32 %v2630_v23, %v2318_v26  ;;  %v3553_v55 = vperm.slane %v3550_v8, 0  ;;  %v2635_v18 = vld [vmem:[%s3886_s7] sm:$0xff] }
  0xfc   : > { %v971_v22 = vadd.f32 %v955_v13, %v898_v52  ;;  %1273 = vmatpush.bf16.msra.mxu2 %v2313_v39  ;;  %v2281_v56 = vor.u32 %v2621_v38, %v2278_v30  ;;  %v2289_v63 = vor.u32 %v2622_v25, %v2286_v62  ;;  %v2317_v43 = vor.u32 %v2634_v60, %v2316_v57  ;;  %v2650_v52 = vld [vmem:[%s3886_s7 + $0x78] sm:$0xff] }
  0xfd   : > { %v982_v54 = vadd.f32 %v3131_v32, %v970_v53  ;;  %1331 = vmatpush.bf16.msra.mxu0 %v2321_v33  ;;  %v3556_v10 = vperm.slane %v3550_v8, 3  ;;  %v3559_v12 = vperm.slane %v3550_v8, 1  ;;  %v2649_v53 = vld [vmem:[%s3886_s7 + $0x70] sm:$0xff] }
  0xfe   : > { %v983_v21 = vadd.f32 %v3131_v32, %v971_v22  ;;  %v2284_v32 = vld [vmem:[%s3884_s5 + $0x18] sm:$0xf] }
  0xff   : > { %v990_v0 = vmax.f32 %v982_v54, 0.0  ;;  %1187 = vmatpush.bf16.msrb.mxu3 %v2269_v28  ;;  %1245 = vmatpush.bf16.msrb.mxu1 %v2277_v50  ;;  %v2285_v15 = vor.u32 %v2626_v14, %v2284_v32  ;;  %v2666_v28 = vld [vmem:[%s3886_s7 + $0xf8] sm:$0xff]  ;;  %v2648_v32 = vld [vmem:[%s3886_s7 + $0x68] sm:$0xff]  ;;  %v2665_v14 = vld [vmem:[%s3886_s7 + $0xf0] sm:$0xff] }
 0x100   : > { %v991_v1 = vmax.f32 %v983_v21, 0.0  ;;  %1274 = vmatpush.bf16.msra.mxu2 %v2281_v56 }
 0x101   : > { %1332 = vmatpush.bf16.msra.mxu0 %v2289_v63 }
 0x102   : > { %v3477_v4 = vpack.c.bf16 %v991_v1, %v990_v0  ;;  %2338 = vmatmul.msk.bf16.vlgmr.msrb.gmra.mxu1 %vm379_vm0, %v3177_v11 }
 0x103   : > { %2051 = vmatpush.bf16.msra.mxu1 %v2642_v40 }
 0x104   : > { %2325 = vmatmul.msk.bf16.vlgmr.msra.gmra.mxu3 %vm379_vm0, %v3477_v4  ;;  %2329 = vmatmul.msk.bf16.gmra.mxu2 %vm379_vm0, %v3477_v4 }
 0x105   : > { %2337 = vmatmul.msk.bf16.gmra.mxu0 %vm379_vm0, %v3477_v4  ;;  %1302 = vmatpush.bf16.msra.mxu3 %v2317_v43 }
 0x106   : > { %2064 = vmatpush.bf16.msrb.mxu2 %v2650_v52 }
 0x107   : > { %2052 = vmatpush.bf16.msra.mxu1 %v2641_v41 }
 0x109   : > { %1303 = vmatpush.bf16.msra.mxu3 %v2285_v15 }
 0x10a   : > { %2065 = vmatpush.bf16.msrb.mxu2 %v2649_v53 }
 0x10b   : > { %2053 = vmatpush.bf16.msra.mxu1 %v2640_v3 }
 0x10e   : > { %2066 = vmatpush.bf16.msrb.mxu2 %v2648_v32 }
 0x10f   : > { %2054 = vmatpush.bf16.msra.mxu1 %v2639_v31 }
 0x112   : > { %2339 = vmatmul.msk.bf16.gmra.mxu1 %vm379_vm0, %v3298_v29 }
 0x113   : > { %2055 = vmatpush.bf16.msra.mxu1 %v2638_v16  ;;  %v2647_v16 = vld [vmem:[%s3886_s7 + $0x60] sm:$0xff] }
 0x114   : > { %2330 = vmatmul.msk.bf16.vlgmr.msrb.gmra.mxu3 %vm379_vm0, %v3177_v11  ;;  %2342 = vmatmul.msk.bf16.vlgmr.msra.gmra.mxu2 %vm379_vm0, %v3177_v11 }
 0x115   : > { %2350 = vmatmul.msk.bf16.vlgmr.msra.gmra.mxu0 %vm379_vm0, %v3177_v11  ;;  %2067 = vmatpush.bf16.msrb.mxu2 %v2647_v16 }
 0x117   : > { %2056 = vmatpush.bf16.msra.mxu1 %v2637_v47 }
 0x11b   : > { %2057 = vmatpush.bf16.msra.mxu1 %v2636_v49 }
 0x11f   : > { %2058 = vmatpush.bf16.msra.mxu1 %v2635_v18 }
 0x122   : > { %2340 = vmatmul.msk.bf16.gmra.mxu1 %vm379_vm0, %v3382_v44 }
 0x123   : > { %2090 = vmatpush.bf16.msrb.mxu1 %v2666_v28 }
 0x124   : > { %2331 = vmatmul.msk.bf16.gmra.mxu3 %vm379_vm0, %v3298_v29  ;;  %2343 = vmatmul.msk.bf16.gmra.mxu2 %vm379_vm0, %v3298_v29 }
 0x125   : > { %2351 = vmatmul.msk.bf16.gmra.mxu0 %vm379_vm0, %v3298_v29 }
 0x127   : > { %2091 = vmatpush.bf16.msrb.mxu1 %v2665_v14 }
 0x132   : > { %2341 = vmatmul.msk.bf16.gmra.mxu1 %vm379_vm0, %v3477_v4 }
 0x134   : > { %2332 = vmatmul.msk.bf16.gmra.mxu3 %vm379_vm0, %v3382_v44  ;;  %2344 = vmatmul.msk.bf16.gmra.mxu2 %vm379_vm0, %v3382_v44 }
 0x135   : > { %2352 = vmatmul.msk.bf16.gmra.mxu0 %vm379_vm0, %v3382_v44 }
 0x143   : > { %v1131_v2 = vpop.f32.mrf.mxu1 }
 0x144   : > { %2333 = vmatmul.msk.bf16.gmra.mxu3 %vm379_vm0, %v3477_v4  ;;  %2345 = vmatmul.msk.bf16.gmra.mxu2 %vm379_vm0, %v3477_v4  ;;  %v1218_v19 = vpop.f32.mrf.mxu0  ;;  %v1132_v24 = vadd.f32 %v1131_v2, %v3553_v55 }
 0x145   : > { %2353 = vmatmul.msk.bf16.gmra.mxu0 %vm379_vm0, %v3477_v4  ;;  %v1219_v9 = vadd.f32 %v1218_v19, %v3556_v10 }
 0x146   : > { %v1354_v39 = vmax.f32 %v1132_v24, 0.0 }
 0x147   : > { %v1357_v22 = vmax.f32 %v1219_v9, 0.0 }
 0x149   : > { %v1160_v58 = vpop.f32.mrf.mxu2 }
 0x14a   : > { %v1161_v23 = vadd.f32 %v1160_v58, %v3559_v12 }
 0x14b   : > { %v1133_v35 = vpop.f32.mrf.mxu1 }
 0x14c   : > { %v1220_v34 = vpop.f32.mrf.mxu0  ;;  %v1134_v51 = vadd.f32 %v1133_v35, %v3553_v55  ;;  %v1355_v56 = vmax.f32 %v1161_v23, 0.0  ;;  %v2663_v23 = vld [vmem:[%s3886_s7 + $0xe0] sm:$0xff] }
 0x14d   : > { %v1221_v5 = vadd.f32 %v1220_v34, %v3556_v10 }
 0x14e   : > { %v1362_v38 = vmax.f32 %v1134_v51, 0.0 }
 0x14f   : > { %v1365_v25 = vmax.f32 %v1221_v5, 0.0 }
 0x150   : > { %v1418_v63 = vadd.f32 %v1362_v38, %v1354_v39 }
 0x151   : > { %v1162_v42 = vpop.f32.mrf.mxu2  ;;  %v1457_v15 = vadd.f32 %v1365_v25, %v1357_v22 }
 0x152   : > { %v1163_v36 = vadd.f32 %v1162_v42, %v3559_v12 }
 0x154   : > { %2346 = vmatmul.msk.bf16.vlgmr.msra.gmra.mxu3 %vm379_vm0, %v3177_v11  ;;  %v1363_v50 = vmax.f32 %v1163_v36, 0.0 }
 0x156   : > { %v1431_v19 = vadd.f32 %v1363_v50, %v1355_v56 }
 0x15b   : > { %v1136_v20 = vpop.f32.mrf.mxu1 }
 0x15c   : > { %v1223_v45 = vpop.f32.mrf.mxu0  ;;  %v1137_v37 = vadd.f32 %v1136_v20, %v3553_v55 }
 0x15d   : > { %v1224_v26 = vadd.f32 %v1223_v45, %v3556_v10 }
 0x15e   : > { %v1370_v33 = vmax.f32 %v1137_v37, 0.0  ;;  %v2646_v37 = vld [vmem:[%s3886_s7 + $0x58] sm:$0xff] }
 0x15f   : > { %v1373_v21 = vmax.f32 %v1224_v26, 0.0  ;;  %2068 = vmatpush.bf16.msrb.mxu2 %v2646_v37  ;;  %v2673_v37 = vld [vmem:[%s3886_s7 + $0x130] sm:$0xff] }
 0x160   : > { %v1419_v58 = vadd.f32 %v1418_v63, %v1370_v33  ;;  %v2645_v33 = vld [vmem:[%s3886_s7 + $0x50] sm:$0xff] }
 0x161   : > { %v1165_v61 = vpop.f32.mrf.mxu2  ;;  %v1458_v42 = vadd.f32 %v1457_v15, %v1373_v21 }
 0x162   : > { %v1166_v30 = vadd.f32 %v1165_v61, %v3559_v12 }
 0x163   : > { %v1138_v11 = vpop.f32.mrf.mxu1  ;;  %2069 = vmatpush.bf16.msrb.mxu2 %v2645_v33  ;;  %v2671_v33 = vld [vmem:[%s3886_s7 + $0x120] sm:$0xff] }
 0x164   : > { %2347 = vmatmul.msk.bf16.gmra.mxu3 %vm379_vm0, %v3298_v29  ;;  %v1225_v7 = vpop.f32.mrf.mxu0  ;;  %v1139_v13 = vadd.f32 %v1138_v11, %v3553_v55  ;;  %v1371_v0 = vmax.f32 %v1166_v30, 0.0 }
 0x165   : > { %v1226_v54 = vadd.f32 %v1225_v7, %v3556_v10 }
 0x166   : > { %v1378_v1 = vmax.f32 %v1139_v13, 0.0  ;;  %v1432_v11 = vadd.f32 %v1431_v19, %v1371_v0 }
 0x167   : > { %v1381_v35 = vmax.f32 %v1226_v54, 0.0  ;;  %v2662_v54 = vld [vmem:[%s3886_s7 + $0xd8] sm:$0xff] }
 0x168   : > { %v1420_v31 = vadd.f32 %v1419_v58, %v1378_v1  ;;  %v2644_v1 = vld [vmem:[%s3886_s7 + $0x48] sm:$0xff] }
 0x169   : > { %v1167_v17 = vpop.f32.mrf.mxu2  ;;  %v1459_v51 = vadd.f32 %v1458_v42, %v1381_v35  ;;  %2070 = vmatpush.bf16.msrb.mxu2 %v2644_v1 }
 0x16a   : > { %v1168_v57 = vadd.f32 %v1167_v17, %v3559_v12 }
 0x16c   : > { %v1379_v3 = vmax.f32 %v1168_v57, 0.0 }
 0x16e   : > { %v1141_v46 = vpop.f32.mrf.mxu1  ;;  %v1433_v24 = vadd.f32 %v1432_v11, %v1379_v3 }
 0x16f   : > { %v1228_v48 = vpop.f32.mrf.mxu0  ;;  %v1142_v60 = vadd.f32 %v1141_v46, %v3553_v55  ;;  %v2664_v46 = vld [vmem:[%s3886_s7 + $0xe8] sm:$0xff] }
 0x170   : > { %v1229_v43 = vadd.f32 %v1228_v48, %v3556_v10  ;;  %2092 = vmatpush.bf16.msrb.mxu1 %v2664_v46 }
 0x171   : > { %v1386_v20 = vmax.f32 %v1142_v60, 0.0 }
 0x172   : > { %v1389_v7 = vmax.f32 %v1229_v43, 0.0  ;;  %v2661_v43 = vld [vmem:[%s3886_s7 + $0xd0] sm:$0xff] }
 0x173   : > { %v1421_v5 = vadd.f32 %v1420_v31, %v1386_v20  ;;  %v2658_v31 = vld [vmem:[%s3886_s7 + $0xb8] sm:$0xff] }
 0x174   : > { %2348 = vmatmul.msk.bf16.gmra.mxu3 %vm379_vm0, %v3382_v44  ;;  %v1170_v29 = vpop.f32.mrf.mxu2  ;;  %v1460_v9 = vadd.f32 %v1459_v51, %v1389_v7  ;;  %2093 = vmatpush.bf16.msrb.mxu1 %v2663_v23  ;;  %v2674_v7 = vld [vmem:[%s3886_s7 + $0x138] sm:$0xff]  ;;  %v2656_v23 = vld [vmem:[%s3886_s7 + $0xa8] sm:$0xff] }
 0x175   : > { %v1171_v2 = vadd.f32 %v1170_v29, %v3559_v12  ;;  %2077 = vmatpush.bf16.msrb.mxu3 %v2658_v31 }
 0x176   : > { %v1143_v6 = vpop.f32.mrf.mxu1 }
 0x177   : > { %v1230_v59 = vpop.f32.mrf.mxu0  ;;  %v1387_v47 = vmax.f32 %v1171_v2, 0.0 }
 0x178   : > { %v1231_v34 = vadd.f32 %v1230_v59, %v3556_v10  ;;  %2094 = vmatpush.bf16.msrb.mxu1 %v2662_v54  ;;  %v2654_v54 = vld [vmem:[%s3886_s7 + $0x98] sm:$0xff] }
 0x179   : > { %v1434_v26 = vadd.f32 %v1433_v24, %v1387_v47  ;;  %v2657_v47 = vld [vmem:[%s3886_s7 + $0xb0] sm:$0xff] }
 0x17a   : > { %2078 = vmatpush.bf16.msrb.mxu3 %v2657_v47 }
 0x17c   : > { %v1172_v44 = vpop.f32.mrf.mxu2  ;;  %2095 = vmatpush.bf16.msrb.mxu1 %v2661_v43 }
 0x17d   : > { %v1173_v45 = vadd.f32 %v1172_v44, %v3559_v12  ;;  %v1397_v44 = vmax.f32 %v1231_v34, 0.0  ;;  %v2643_v34 = vld [vmem:[%s3886_s7 + $0x40] sm:$0xff] }
 0x17e   : > { %2071 = vmatpush.bf16.msrb.mxu2 %v2643_v34  ;;  %2079 = vmatpush.bf16.msrb.mxu3 %v2656_v23 }
 0x17f   : > { %v3575_v27 = vpop.f32.mrf.mxu1  ;;  %v1395_v49 = vmax.f32 %v1173_v45, 0.0  ;;  %v1461_v13 = vadd.f32 %v1460_v9, %v1397_v44 }
 0x182   : > { %v1233_v62 = vpop.f32.mrf.mxu0  ;;  %2103 = vmatpush.bf16.msra.mxu2 %v2674_v7  ;;  %v3714_v7 = vperm.slane %v3550_v8, 2 }
 0x183   : > { %v1234_v17 = vadd.f32 %v1233_v62, %v3556_v10 }
 0x184   : > { %2349 = vmatmul.msk.bf16.gmra.mxu3 %vm379_vm0, %v3477_v4  ;;  %v1144_v4 = vadd.f32 %v1143_v6, %v3553_v55 }
 0x185   : > { %v1405_v36 = vmax.f32 %v1234_v17, 0.0  ;;  %v2659_v17 = vld [vmem:[%s3886_s7 + $0xc0] sm:$0xff] }
 0x186   : > { %v1394_v48 = vmax.f32 %v1144_v4, 0.0  ;;  %2104 = vmatpush.bf16.msra.mxu2 %v2673_v37 }
 0x187   : > { %v1146_v40 = vpop.f32.mrf.mxu3  ;;  %v1175_v41 = vpop.f32.mrf.mxu2  ;;  %v1462_v50 = vadd.f32 %v1461_v13, %v1405_v36  ;;  %v2655_v13 = vld [vmem:[%s3886_s7 + $0xa0] sm:$0xff] }
 0x188   : > { %v3604_v61 = vpop.f32.mrf.mxu1  ;;  %v1147_v29 = vadd.f32 %v1146_v40, %v3553_v55  ;;  %v1176_v6 = vadd.f32 %v1175_v41, %v3559_v12  ;;  %v1422_v18 = vadd.f32 %v1421_v5, %v1394_v48  ;;  %v2660_v40 = vld [vmem:[%s3886_s7 + $0xc8] sm:$0xff]  ;;  %2080 = vmatpush.bf16.msrb.mxu3 %v2655_v13 }
 0x189   : > { %2096 = vmatpush.bf16.msrb.mxu1 %v2660_v40 }
 0x18a   : > { %v1235_v59 = vpop.f32.mrf.mxu0  ;;  %v1402_v38 = vmax.f32 %v1147_v29, 0.0  ;;  %v1403_v30 = vmax.f32 %v1176_v6, 0.0 }
 0x18b   : > { %v1236_v52 = vadd.f32 %v1235_v59, %v3556_v10  ;;  %v1435_v10 = vadd.f32 %v1434_v26, %v1395_v49  ;;  %v1018_v26 = vperm.slane %v3550_v8, 4 }
 0x18c   : > { %v1423_v56 = vadd.f32 %v1422_v18, %v1402_v38  ;;  %2081 = vmatpush.bf16.msrb.mxu3 %v2654_v54 }
 0x18d   : > { %v1413_v25 = vmax.f32 %v1236_v52, 0.0  ;;  %v1436_v57 = vadd.f32 %v1435_v10, %v1403_v30  ;;  %2097 = vmatpush.bf16.msrb.mxu1 %v2659_v17  ;;  %v2672_v30 = vld [vmem:[%s3886_s7 + $0x128] sm:$0xff]  ;;  %v1250_v10 = vadd.f32 %v3604_v61, %v1018_v26  ;;  %v2698_v61 = vld [vmem:[%s3886_s7 + $0x1f8] sm:$0xff]  ;;  %v3717_v17 = vperm.slane %v3550_v8, 7 }
 0x18e   : > { %2105 = vmatpush.bf16.msra.mxu2 %v2672_v30 }
 0x18f   : > { %v1148_v53 = vpop.f32.mrf.mxu3  ;;  %v1177_v28 = vpop.f32.mrf.mxu2  ;;  %v1463_v63 = vadd.f32 %v1462_v50, %v1413_v25  ;;  %v1248_v25 = vadd.f32 %v3575_v27, %v1018_v26 }
 0x190   : > { %v1149_v39 = vadd.f32 %v1148_v53, %v3553_v55  ;;  %v1178_v62 = vadd.f32 %v1177_v28, %v3559_v12  ;;  %v3624_v22 = vpop.f32.mrf.mxu1 }
 0x191   : > { %v1464_v19 = vrot.slane %v1463_v63, 4  ;;  %v1358_v27 = vmax.f32 %v1248_v25, 0.0 }
 0x192   : > { %v1410_v21 = vmax.f32 %v1149_v39, 0.0  ;;  %v1411_v55 = vmax.f32 %v1178_v62, 0.0  ;;  %v3632_v60 = vpop.f32.mrf.mxu0  ;;  %v1253_v62 = vadd.f32 %v3624_v22, %v1018_v26  ;;  %2106 = vmatpush.bf16.msra.mxu2 %v2671_v33 }
 0x193   : > { %v1465_v45 = vadd.f32 %v1464_v19, %v1463_v63  ;;  %v2670_v63 = vld [vmem:[%s3886_s7 + $0x118] sm:$0xff] }
 0x194   : > { %v1424_v12 = vadd.f32 %v1423_v56, %v1410_v21  ;;  %v1437_v0 = vadd.f32 %v1436_v57, %v1411_v55  ;;  %v1366_v56 = vmax.f32 %v1250_v10, 0.0  ;;  %v1374_v57 = vmax.f32 %v1253_v62, 0.0 }
 0x195   : > { %v1466_v6 = vrot.slane %v1465_v45, 2 }
 0x196   : > { %v1425_v32 = vrot.slane %v1424_v12, 4  ;;  %v1438_v14 = vrot.slane %v1437_v0, 4  ;;  %2107 = vmatpush.bf16.msra.mxu2 %v2670_v63 }
 0x197   : > { %v3640_v15 = vpop.f32.mrf.mxu3  ;;  %v3642_v2 = vpop.f32.mrf.mxu2  ;;  %v1467_v52 = vadd.f32 %v1466_v6, %v1465_v45 }
 0x198   : > { %v1426_v4 = vadd.f32 %v1425_v32, %v1424_v12  ;;  %v1439_v58 = vadd.f32 %v1438_v14, %v1437_v0  ;;  %v1254_v35 = vpop.f32.mrf.mxu1  ;;  %v2653_v0 = vld [vmem:[%s3886_s7 + $0x90] sm:$0xff]  ;;  %v1470_v32 = vadd.f32 %v1366_v56, %v1358_v27 }
 0x199   : > { %v1468_v53 = vrot.slane %v1467_v52, 1  ;;  %v1255_v21 = vadd.f32 %v1254_v35, %v1018_v26  ;;  %2082 = vmatpush.bf16.msrb.mxu3 %v2653_v0 }
 0x19a   : > { %v1427_v41 = vrot.slane %v1426_v4, 2  ;;  %v1440_v42 = vrot.slane %v1439_v58, 2  ;;  %v3650_v3 = vpop.f32.mrf.mxu0 }
 0x19b   : > { %v1469_v50 = vadd.f32 %v1468_v53, %v1467_v52  ;;  %v1382_v14 = vmax.f32 %v1255_v21, 0.0  ;;  %v1335_v52 = vadd.f32 %v3632_v60, %v3717_v17  ;;  %v2697_v60 = vld [vmem:[%s3886_s7 + $0x1f0] sm:$0xff] }
 0x19c   : > { %v1428_v20 = vadd.f32 %v1427_v41, %v1426_v4  ;;  %v1441_v11 = vadd.f32 %v1440_v42, %v1439_v58  ;;  %v1471_v58 = vadd.f32 %v1470_v32, %v1374_v57  ;;  %v2682_v57 = vld [vmem:[%s3886_s7 + $0x178] sm:$0xff] }
 0x19d   : > { %v1525_v1 = vmul.f32 0.015625, %v1469_v50  ;;  %v1361_v10 = vmax.f32 %v1335_v52, 0.0  ;;  %v2668_v50 = vld [vmem:[%s3886_s7 + $0x108] sm:$0xff] }
 0x19e   : > { %v1429_v16 = vrot.slane %v1428_v20, 1  ;;  %v1442_v46 = vrot.slane %v1441_v11, 1  ;;  %v1472_v41 = vadd.f32 %v1471_v58, %v1382_v14 }
 0x19f   : > { %v3664_v48 = vpop.f32.mrf.mxu3  ;;  %v3666_v29 = vpop.f32.mrf.mxu2  ;;  %v1533_v40 = vpack.c.bf16 %v1525_v1, %v1525_v1 }
 0x1a0   : > { %v1430_v59 = vadd.f32 %v1429_v16, %v1428_v20  ;;  %v1257_v51 = vpop.f32.mrf.mxu1  ;;  %v1443_v44 = vadd.f32 %v1442_v46, %v1441_v11  ;;  %v1192_v6 = vadd.f32 %v3664_v48, %v3714_v7 }
 0x1a1   : > { %v1258_v22 = vadd.f32 %v1257_v51, %v1018_v26 }
 0x1a2   : > { %v1522_v24 = vmul.f32 0.015625, %v1430_v59  ;;  %v3668_v5 = vpop.f32.mrf.mxu0  ;;  %v1523_v49 = vmul.f32 0.015625, %v1443_v44  ;;  %v1337_v59 = vadd.f32 %v3650_v3, %v3717_v17  ;;  %v1364_v48 = vmax.f32 %v1192_v6, 0.0 }
 0x1a3   : > { %v1390_v35 = vmax.f32 %v1258_v22, 0.0 }
 0x1a4   : > { %v1530_v9 = vpack.c.bf16 %v1522_v24, %v1522_v24  ;;  %v1531_v36 = vpack.c.bf16 %v1523_v49, %v1523_v49  ;;  %v1190_v49 = vadd.f32 %v3640_v15, %v3714_v7  ;;  %v1369_v23 = vmax.f32 %v1337_v59, 0.0  ;;  %v2652_v15 = vld [vmem:[%s3886_s7 + $0x88] sm:$0xff] }
 0x1a5   : > { %v1473_v20 = vadd.f32 %v1472_v41, %v1390_v35  ;;  %2083 = vmatpush.bf16.msrb.mxu3 %v2652_v15  ;;  %v2680_v15 = vld [vmem:[%s3886_s7 + $0x168] sm:$0xff] }
 0x1a6   : > { %2059 = vmatmul.bf16.vlgmr.msra.gmra.mxu1 %v1530_v9  ;;  %2072 = vmatmul.bf16.vlgmr.msrb.gmra.mxu2 %v1531_v36  ;;  %v3728_v9 = vperm.slane %v3550_v8, 5  ;;  %v1340_v36 = vadd.f32 %v3668_v5, %v3717_v17  ;;  %v1509_v21 = vadd.f32 %v1369_v23, %v1361_v10 }
 0x1a7   : > { %v3677_v18 = vpop.f32.mrf.mxu3  ;;  %v3679_v38 = vpop.f32.mrf.mxu2  ;;  %2142 = vmatpush.bf16.msra.mxu1 %v2698_v61 }
 0x1a8   : > { %v1259_v28 = vpop.f32.mrf.mxu1  ;;  %v1279_v3 = vadd.f32 %v3666_v29, %v3728_v9  ;;  %v1195_v5 = vadd.f32 %v3677_v18, %v3714_v7  ;;  %v1277_v25 = vadd.f32 %v3642_v2, %v3728_v9  ;;  %v1377_v62 = vmax.f32 %v1340_v36, 0.0  ;;  %v2696_v18 = vld [vmem:[%s3886_s7 + $0x1e8] sm:$0xff]  ;;  %v2651_v2 = vld [vmem:[%s3886_s7 + $0x80] sm:$0xff] }
 0x1a9   : > { %v1260_v4 = vadd.f32 %v1259_v28, %v1018_v26  ;;  %v1356_v28 = vmax.f32 %v1190_v49, 0.0  ;;  %2084 = vmatpush.bf16.msrb.mxu3 %v2651_v2 }
 0x1aa   : > { %v1341_v39 = vpop.f32.mrf.mxu0  ;;  %v1367_v61 = vmax.f32 %v1279_v3, 0.0  ;;  %v1372_v22 = vmax.f32 %v1195_v5, 0.0  ;;  %v1359_v1 = vmax.f32 %v1277_v25, 0.0  ;;  %v2693_v25 = vld [vmem:[%s3886_s7 + $0x1d0] sm:$0xff] }
 0x1ab   : > { %v1398_v42 = vmax.f32 %v1260_v4, 0.0  ;;  %v1342_v30 = vadd.f32 %v1341_v39, %v3717_v17  ;;  %2143 = vmatpush.bf16.msra.mxu1 %v2697_v60  ;;  %v1282_v39 = vadd.f32 %v3679_v38, %v3728_v9  ;;  %v1444_v56 = vadd.f32 %v1364_v48, %v1356_v28  ;;  %v2667_v4 = vld [vmem:[%s3886_s7 + $0x100] sm:$0xff] }
 0x1ad   : > { %v1474_v46 = vadd.f32 %v1473_v20, %v1398_v42  ;;  %v1385_v63 = vmax.f32 %v1342_v30, 0.0  ;;  %v1375_v58 = vmax.f32 %v1282_v39, 0.0  ;;  %2116 = vmatpush.bf16.msra.mxu3 %v2682_v57  ;;  %v2681_v42 = vld [vmem:[%s3886_s7 + $0x170] sm:$0xff]  ;;  %v2690_v20 = vld [vmem:[%s3886_s7 + $0x1b8] sm:$0xff] }
 0x1ae   : > { %2129 = vmatpush.bf16.msrb.mxu0 %v2690_v20  ;;  %v2689_v39 = vld [vmem:[%s3886_s7 + $0x1b0] sm:$0xff] }
 0x1af   : > { %v3699_v55 = vpop.f32.mrf.mxu3  ;;  %v3701_v12 = vpop.f32.mrf.mxu2  ;;  %2144 = vmatpush.bf16.msra.mxu1 %v2696_v18 }
 0x1b0   : > { %v1262_v43 = vpop.f32.mrf.mxu1  ;;  %v1197_v32 = vadd.f32 %v3699_v55, %v3714_v7  ;;  %v1284_v14 = vadd.f32 %v3701_v12, %v3728_v9  ;;  %v1483_v55 = vadd.f32 %v1367_v61, %v1359_v1 }
 0x1b1   : > { %v1263_v34 = vadd.f32 %v1262_v43, %v1018_v26  ;;  %v1510_v43 = vadd.f32 %v1509_v21, %v1377_v62  ;;  %2117 = vmatpush.bf16.msra.mxu3 %v2681_v42 }
 0x1b2   : > { %v1344_v19 = vpop.f32.mrf.mxu0  ;;  %v1484_v49 = vadd.f32 %v1483_v55, %v1375_v58  ;;  %2130 = vmatpush.bf16.msrb.mxu0 %v2689_v39  ;;  %v2677_v55 = vld [vmem:[%s3886_s7 + $0x150] sm:$0xff] }
 0x1b3   : > { %v1406_v11 = vmax.f32 %v1263_v34, 0.0  ;;  %v1345_v33 = vadd.f32 %v1344_v19, %v3717_v17  ;;  %v2695_v19 = vld [vmem:[%s3886_s7 + $0x1e0] sm:$0xff] }
 0x1b4   : > { %2145 = vmatpush.bf16.msra.mxu1 %v2695_v19  ;;  %v2678_v19 = vld [vmem:[%s3886_s7 + $0x158] sm:$0xff] }
 0x1b5   : > { %v1475_v44 = vadd.f32 %v1474_v46, %v1406_v11  ;;  %v1393_v35 = vmax.f32 %v1345_v33, 0.0  ;;  %v1445_v11 = vadd.f32 %v1444_v56, %v1372_v22  ;;  %2118 = vmatpush.bf16.msra.mxu3 %v2680_v15  ;;  %v2679_v56 = vld [vmem:[%s3886_s7 + $0x160] sm:$0xff] }
 0x1b6   : > { %2098 = vmatmul.bf16.vlgmr.msrb.gmra.mxu1 %v1533_v40 }
 0x1b7   : > { %v3709_v45 = vpop.f32.mrf.mxu3  ;;  %v3711_v31 = vpop.f32.mrf.mxu2 }
 0x1b8   : > { %v1264_v16 = vpop.f32.mrf.mxu1  ;;  %v1200_v12 = vadd.f32 %v3709_v45, %v3714_v7  ;;  %v1287_v41 = vadd.f32 %v3711_v31, %v3728_v9  ;;  %v1383_v45 = vmax.f32 %v1284_v14, 0.0 }
 0x1b9   : > { %v1265_v47 = vadd.f32 %v1264_v16, %v1018_v26  ;;  %v2669_v26 = vld [vmem:[%s3886_s7 + $0x110] sm:$0xff]  ;;  %v1511_v16 = vadd.f32 %v1510_v43, %v1385_v63  ;;  %2119 = vmatpush.bf16.msra.mxu3 %v2679_v56 }
 0x1ba   : > { %v1346_v51 = vpop.f32.mrf.mxu0  ;;  %2108 = vmatpush.bf16.msra.mxu2 %v2669_v26  ;;  %v1388_v48 = vmax.f32 %v1200_v12, 0.0  ;;  %v1391_v23 = vmax.f32 %v1287_v41, 0.0  ;;  %v2688_v12 = vld [vmem:[%s3886_s7 + $0x1a8] sm:$0xff] }
 0x1bb   : > { %v1414_v24 = vmax.f32 %v1265_v47, 0.0  ;;  %v1347_v38 = vadd.f32 %v1346_v51, %v3717_v17  ;;  %v1380_v51 = vmax.f32 %v1197_v32, 0.0  ;;  %v1512_v52 = vadd.f32 %v1511_v16, %v1393_v35  ;;  %2131 = vmatpush.bf16.msrb.mxu0 %v2688_v12 }
 0x1bd   : > { %v1476_v37 = vadd.f32 %v1475_v44, %v1414_v24  ;;  %v1401_v47 = vmax.f32 %v1347_v38, 0.0  ;;  %v2694_v24 = vld [vmem:[%s3886_s7 + $0x1d8] sm:$0xff]  ;;  %v2692_v38 = vld [vmem:[%s3886_s7 + $0x1c8] sm:$0xff]  ;;  %2120 = vmatpush.bf16.msra.mxu3 %v2678_v19 }
 0x1be   : > { %2109 = vmatpush.bf16.msra.mxu2 %v2668_v50  ;;  %2146 = vmatpush.bf16.msra.mxu1 %v2694_v24  ;;  %v2675_v24 = vld [vmem:[%s3886_s7 + $0x140] sm:$0xff] }
 0x1bf   : > { %v1201_v13 = vpop.f32.mrf.mxu3  ;;  %v1477_v53 = vrot.slane %v1476_v37, 4  ;;  %v1288_v29 = vpop.f32.mrf.mxu2  ;;  %v1513_v5 = vadd.f32 %v1512_v52, %v1401_v47  ;;  %v2676_v47 = vld [vmem:[%s3886_s7 + $0x148] sm:$0xff] }
 0x1c0   : > { %v1202_v44 = vadd.f32 %v1201_v13, %v3714_v7  ;;  %v1289_v31 = vadd.f32 %v1288_v29, %v3728_v9  ;;  %v1485_v29 = vadd.f32 %v1484_v49, %v1383_v45  ;;  %v2687_v45 = vld [vmem:[%s3886_s7 + $0x1a0] sm:$0xff] }
 0x1c1   : > { %v1478_v54 = vadd.f32 %v1477_v53, %v1476_v37  ;;  %v1446_v53 = vadd.f32 %v1445_v11, %v1380_v51  ;;  %2121 = vmatpush.bf16.msra.mxu3 %v2677_v55  ;;  %2132 = vmatpush.bf16.msrb.mxu0 %v2687_v45 }
 0x1c2   : > { %v1349_v27 = vpop.f32.mrf.mxu0  ;;  %2110 = vmatpush.bf16.msra.mxu2 %v2667_v4  ;;  %v1396_v28 = vmax.f32 %v1202_v44, 0.0  ;;  %v1399_v10 = vmax.f32 %v1289_v31, 0.0  ;;  %2147 = vmatpush.bf16.msra.mxu1 %v2693_v25  ;;  %v2684_v25 = vld [vmem:[%s3886_s7 + $0x188] sm:$0xff] }
 0x1c3   : > { %v1479_v0 = vrot.slane %v1478_v54, 2  ;;  %v1350_v40 = vadd.f32 %v1349_v27, %v3717_v17  ;;  %v1447_v33 = vadd.f32 %v1446_v53, %v1388_v48 }
 0x1c5   : > { %v1480_v34 = vadd.f32 %v1479_v0, %v1478_v54  ;;  %v1409_v36 = vmax.f32 %v1350_v40, 0.0  ;;  %v1486_v54 = vadd.f32 %v1485_v29, %v1391_v23  ;;  %v1448_v57 = vadd.f32 %v1447_v33, %v1396_v28  ;;  %2122 = vmatpush.bf16.msra.mxu3 %v2676_v47 }
 0x1c6   : > { %2148 = vmatpush.bf16.msra.mxu1 %v2692_v38 }
 0x1c7   : > { %v1481_v46 = vrot.slane %v1480_v34, 1  ;;  %v1204_v6 = vpop.f32.mrf.mxu3  ;;  %v1291_v59 = vpop.f32.mrf.mxu2  ;;  %v1514_v62 = vadd.f32 %v1513_v5, %v1409_v36  ;;  %v1487_v22 = vadd.f32 %v1486_v54, %v1399_v10  ;;  %v1020_v10 = vperm.slane %v3550_v8, 6 }
 0x1c8   : > { %v1205_v3 = vadd.f32 %v1204_v6, %v3714_v7  ;;  %v1292_v26 = vadd.f32 %v1291_v59, %v3728_v9 }
 0x1c9   : > { %v1482_v37 = vadd.f32 %v1481_v46, %v1480_v34  ;;  %2123 = vmatpush.bf16.msra.mxu3 %v2675_v24 }
 0x1ca   : > { %v1351_v60 = vpop.f32.mrf.mxu0  ;;  %v1407_v2 = vmax.f32 %v1292_v26, 0.0  ;;  %v2686_v26 = vld [vmem:[%s3886_s7 + $0x198] sm:$0xff] }
 0x1cb   : > { %v1352_v30 = vadd.f32 %v1351_v60, %v3717_v17  ;;  %v1526_v13 = vmul.f32 0.015625, %v1482_v37  ;;  %v1404_v17 = vmax.f32 %v1205_v3, 0.0  ;;  %2133 = vmatpush.bf16.msrb.mxu0 %v2686_v26 }
 0x1cc   : > { %v1488_v14 = vadd.f32 %v1487_v22, %v1407_v2 }
 0x1cd   : > { %v1417_v50 = vmax.f32 %v1352_v30, 0.0  ;;  %v1534_v18 = vpack.c.bf16 %v1526_v13, %v1526_v13  ;;  %v1449_v43 = vadd.f32 %v1448_v57, %v1404_v17  ;;  %v2685_v30 = vld [vmem:[%s3886_s7 + $0x190] sm:$0xff] }
 0x1cf   : > { %v1206_v21 = vpop.f32.mrf.mxu3  ;;  %v1515_v61 = vadd.f32 %v1514_v62, %v1417_v50  ;;  %v1293_v27 = vpop.f32.mrf.mxu2  ;;  %2111 = vmatmul.bf16.vlgmr.msra.gmra.mxu2 %v1534_v18  ;;  %2134 = vmatpush.bf16.msrb.mxu0 %v2685_v30  ;;  %v2683_v18 = vld [vmem:[%s3886_s7 + $0x180] sm:$0xff] }
 0x1d0   : > { %v1207_v63 = vadd.f32 %v1206_v21, %v3714_v7  ;;  %v1294_v0 = vadd.f32 %v1293_v27, %v3728_v9  ;;  %v2691_v9 = vld [vmem:[%s3886_s7 + $0x1c0] sm:$0xff] }
 0x1d1   : > { %v1516_v1 = vrot.slane %v1515_v61, 4  ;;  %2149 = vmatpush.bf16.msra.mxu1 %v2691_v9 }
 0x1d2   : > { %v1412_v32 = vmax.f32 %v1207_v63, 0.0  ;;  %v1415_v4 = vmax.f32 %v1294_v0, 0.0 }
 0x1d3   : > { %v1517_v58 = vadd.f32 %v1516_v1, %v1515_v61  ;;  %2135 = vmatpush.bf16.msrb.mxu0 %v2684_v25 }
 0x1d4   : > { %v1450_v35 = vadd.f32 %v1449_v43, %v1412_v32  ;;  %v1489_v7 = vadd.f32 %v1488_v14, %v1415_v4 }
 0x1d5   : > { %v1518_v34 = vrot.slane %v1517_v58, 2 }
 0x1d6   : > { %v1451_v40 = vrot.slane %v1450_v35, 4  ;;  %v1490_v11 = vrot.slane %v1489_v7, 4 }
 0x1d7   : > { %v1519_v41 = vadd.f32 %v1518_v34, %v1517_v58  ;;  %v1305_v42 = vpop.f32.mrf.mxu3  ;;  %2136 = vmatpush.bf16.msrb.mxu0 %v2683_v18 }
 0x1d8   : > { %v1452_v20 = vadd.f32 %v1451_v40, %v1450_v35  ;;  %v1491_v51 = vadd.f32 %v1490_v11, %v1489_v7  ;;  %v1306_v39 = vadd.f32 %v1305_v42, %v1020_v10 }
 0x1d9   : > { %v1520_v16 = vrot.slane %v1519_v41, 1 }
 0x1da   : > { %v1453_v46 = vrot.slane %v1452_v20, 2  ;;  %v1492_v36 = vrot.slane %v1491_v51, 2  ;;  %v1360_v2 = vmax.f32 %v1306_v39, 0.0 }
 0x1db   : > { %v1521_v6 = vadd.f32 %v1520_v16, %v1519_v41  ;;  %v1666_v16 = vld [vmem:[%s3887_s8] sm:$0x1] }
 0x1dc   : > { %v1454_v59 = vadd.f32 %v1453_v46, %v1452_v20  ;;  %v1493_v23 = vadd.f32 %v1492_v36, %v1491_v51 }
 0x1dd   : > { %v1529_v44 = vmul.f32 0.015625, %v1521_v6 }
 0x1de   : > { %v1455_v31 = vrot.slane %v1454_v59, 1  ;;  %v1494_v15 = vrot.slane %v1493_v23, 1 }
 0x1df   : > { %v1307_v49 = vpop.f32.mrf.mxu3  ;;  %v1537_v52 = vpack.c.bf16 %v1529_v44, %v1529_v44 }
 0x1e0   : > { %v1456_v37 = vadd.f32 %v1455_v31, %v1454_v59  ;;  %v1495_v5 = vadd.f32 %v1494_v15, %v1493_v23  ;;  %v1308_v50 = vadd.f32 %v1307_v49, %v1020_v10 }
 0x1e1   : > { %2150 = vmatmul.bf16.vlgmr.msra.gmra.mxu1 %v1537_v52 }
 0x1e2   : > { %v1524_v48 = vmul.f32 0.015625, %v1456_v37  ;;  %v1527_v53 = vmul.f32 0.015625, %v1495_v5  ;;  %v1368_v54 = vmax.f32 %v1308_v50, 0.0 }
 0x1e4   : > { %v1532_v3 = vpack.c.bf16 %v1524_v48, %v1524_v48  ;;  %v1535_v29 = vpack.c.bf16 %v1527_v53, %v1527_v53  ;;  %v1496_v61 = vadd.f32 %v1368_v54, %v1360_v2 }
 0x1e6   : > { %2085 = vmatmul.bf16.vlgmr.msrb.gmra.mxu3 %v1532_v3 }
 0x1e7   : > { %v1310_v60 = vpop.f32.mrf.mxu3 }
 0x1e8   : > { %v1311_v33 = vadd.f32 %v1310_v60, %v1020_v10 }
 0x1ea   : > { %v1376_v56 = vmax.f32 %v1311_v33, 0.0 }
 0x1ec   : > { %v1497_v22 = vadd.f32 %v1496_v61, %v1376_v56 }
 0x1ef   : > { %v1312_v13 = vpop.f32.mrf.mxu3 }
 0x1f0   : > { %v1313_v17 = vadd.f32 %v1312_v13, %v1020_v10 }
 0x1f2   : > { %v1384_v27 = vmax.f32 %v1313_v17, 0.0 }
 0x1f4   : > { %v1498_v38 = vadd.f32 %v1497_v22, %v1384_v27 }
 0x1f6   : > { %2124 = vmatmul.bf16.vlgmr.msra.gmra.mxu3 %v1535_v29 }
 0x1f7   : > { %v1315_v28 = vpop.f32.mrf.mxu3 }
 0x1f8   : > { %v1316_v21 = vadd.f32 %v1315_v28, %v1020_v10 }
 0x1fa   : > { %v1392_v63 = vmax.f32 %v1316_v21, 0.0 }
 0x1fc   : > { %v1499_v43 = vadd.f32 %v1498_v38, %v1392_v63 }
 0x1ff   : > { %v1317_v62 = vpop.f32.mrf.mxu3 }
 0x200   : > { %v1318_v57 = vadd.f32 %v1317_v62, %v1020_v10 }
 0x202   : > { %v1400_v1 = vmax.f32 %v1318_v57, 0.0 }
 0x204   : > { %v1500_v4 = vadd.f32 %v1499_v43, %v1400_v1 }
 0x207   : > { %v1320_v8 = vpop.f32.mrf.mxu3 }
 0x208   : > { %v1321_v0 = vadd.f32 %v1320_v8, %v1020_v10 }
 0x20a   : > { %v1408_v32 = vmax.f32 %v1321_v0, 0.0 }
 0x20c   : > { %v1501_v58 = vadd.f32 %v1500_v4, %v1408_v32 }
 0x20f   : > { %v1322_v14 = vpop.f32.mrf.mxu3 }
 0x210   : > { %v1323_v19 = vadd.f32 %v1322_v14, %v1020_v10 }
 0x212   : > { %v1416_v35 = vmax.f32 %v1323_v19, 0.0 }
 0x214   : > { %v1502_v7 = vadd.f32 %v1501_v58, %v1416_v35 }
 0x216   : > { %v1503_v9 = vrot.slane %v1502_v7, 4 }
 0x218   : > { %v1504_v34 = vadd.f32 %v1503_v9, %v1502_v7 }
 0x21a   : > { %v1505_v40 = vrot.slane %v1504_v34, 2 }
 0x21c   : > { %v1506_v55 = vadd.f32 %v1505_v40, %v1504_v34 }
 0x21e   : > { %v1507_v12 = vrot.slane %v1506_v55, 1 }
 0x220   : > { %v1508_v41 = vadd.f32 %v1507_v12, %v1506_v55 }
 0x222   : > { %v1528_v42 = vmul.f32 0.015625, %v1508_v41 }
 0x223   : > { %v2060_v20 = vpop.f32.mrf.mxu1 }
 0x224   : > { %v1536_v11 = vpack.c.bf16 %v1528_v42, %v1528_v42  ;;  %v2061_v46 = vadd.f32 %v2060_v20, %v1666_v16 }
 0x226   : > { %2137 = vmatmul.bf16.vlgmr.msrb.gmra.mxu0 %v1536_v11 }
 0x229   : > { %v2073_v47 = vpop.f32.mrf.mxu2 }
 0x22a   : > { %v2074_v6 = vadd.f32 %v2073_v47, %v2061_v46 }
 0x22b   : > { %v2062_v59 = vpop.f32.mrf.mxu1 }
 0x231   : > { %v2075_v51 = vpop.f32.mrf.mxu2 }
 0x233   : > { %v2099_v45 = vpop.f32.mrf.mxu1 }
 0x23b   : > { %v2101_v44 = vpop.f32.mrf.mxu1 }
 0x252   : > { %v2112_v31 = vpop.f32.mrf.mxu2 }
 0x25a   : > { %v2114_v24 = vpop.f32.mrf.mxu2 }
 0x25e   : > { %v2151_v49 = vpop.f32.mrf.mxu1 }
 0x266   : > { %v2153_v52 = vpop.f32.mrf.mxu1 }
 0x269   : > { %v2086_v36 = vpop.f32.mrf.mxu3 }
 0x26a   : > { %v2087_v37 = vadd.f32 %v2086_v36, %v2074_v6 }
 0x26c   : > { %v2100_v48 = vadd.f32 %v2099_v45, %v2087_v37 }
 0x26e   : > { %v2113_v23 = vadd.f32 %v2112_v31, %v2100_v48 }
 0x271   : > { %v2088_v3 = vpop.f32.mrf.mxu3 }
 0x279   : > { %v2125_v26 = vpop.f32.mrf.mxu3 }
 0x27a   : > { %v2126_v15 = vadd.f32 %v2125_v26, %v2113_v23 }
 0x281   : > { %v2127_v60 = vpop.f32.mrf.mxu3 }
 0x2a3   : > { %v2138_v5 = vpop.f32.mrf.mxu0 }
 0x2a4   : > { %v2139_v30 = vadd.f32 %v2138_v5, %v2126_v15 }
 0x2a6   : > { %v2152_v13 = vadd.f32 %v2151_v49, %v2139_v30 }
 0x2a8   : > { %2155 = vst [vmem:[%s324_s22] sm:$0x1] %v2152_v13 }
 0x2a9   : > { %2773 = shalt.err (!%p2770_p3)
}
 0x2aa   : > { %2703 = dma.vmem_to_hbm [thread:$0]  (%p2899_p5), %s2168_s23, 16, %s2170_s24, %s2157_s25  }
 0x2ab   : > { %v2140_v53 = vpop.f32.mrf.mxu0 }
 0x2ac PF: > { %p2709_p4 = scmp.ge.s32.totalorder %s2808_s12, 2  ;;  %s2181_s14 = sand.u32 1, %s2796_s30  }
 0x2ad   : > { %s2182_s21 = scalar_lea.sflag [#allocation4], %s2181_s14 }
 0x2ae   : > { %p2706_p7 = pnand %p2709_p4, %p2903_p6 }
 0x2b0   : > { %p2707_p8 = pneg %p2706_p7 }
 0x2b2   : > { %2791 = dma.done.wait (%p2707_p8), %s2182_s21, 16  }
 0x2b3   : > { %2793 = vsyncadd (%p2707_p8), %s2182_s21, 4294967280  ;;  %p19_p9 = scmp.ge.s32.totalorder %s2886_s15, 4   ;;  %s3891_s30 = smov %s2800_s10 }
 0x2b4   : > { %s3892_s10 = smov %s2804_s11  ;;  %s3893_s11 = smov %s2897_s18 }
 0x2b5   : > { %s3894_s12 = smov %s2886_s15  ;;  %21 = sbr.rel (!%p19_p9) target bundleno = 3 (0x3), region = 92 }
 0x2ba   :  { %2187 = vsyncpa [#allocation4], 1 }
 0x2bb   :  { %2189 = vsyncpa [#allocation4 + $0x1], 1 }

</bundles_post_ra>
